<compile_context>
chip_gen: v5e
topology: v5e:2x2
jax: 0.10.0
libtpu: 0.0.40
codegen_flags: <defaults>
</compile_context>

<pallas_src>
import functools

import jax
import jax.numpy as jnp
from jax.experimental import pallas as pl
from jax.experimental.pallas import tpu as pltpu


def _round_up(x, m):
    return (x + m - 1) // m * m


# ----------------------------------------------------------------------------
# Fused kernel.
# Grid = (M_tiles, K_tiles); K innermost, "arbitrary"; M "parallel".
#   acc_ref (VMEM f32 scratch) accumulates big = x @ [W0 | dW_0 | ...].
#   On the last K step: add biases, run MetaNet MLP, coef-weighted combine.
# ----------------------------------------------------------------------------
def _fused_kernel(T, FEAT, COL,
                  xf_ref, wall_ref, ball_ref, mlp_ref,
                  o_ref, acc_ref):
    k = pl.program_id(1)

    @pl.when(k == 0)
    def _():
        acc_ref[...] = jnp.zeros_like(acc_ref)

    # bf16 weight-streaming matmul with f32 accumulation; x is cast on-chip.
    x_bf = xf_ref[...].astype(wall_ref.dtype)
    acc_ref[...] += jnp.dot(x_bf, wall_ref[...],
                            preferred_element_type=jnp.float32)

    @pl.when(k == pl.num_programs(1) - 1)
    def _():
        # base features (f32, lane block 0 of the accumulator)
        feats = acc_ref[:, :FEAT] + ball_ref[:, :FEAT]          # [bm, FEAT]

        # MetaNet MLP (Linear -> ReLU -> Linear), operands come from ONE slab:
        #   rows [0, FEAT)              : W1  (FEAT x COL, zero-padded cols)
        #   row  FEAT                   : b1
        #   rows [FEAT+8, FEAT+8+COL)   : W2  (COL x COL, zero-padded)
        #   row  FEAT+8+COL             : b2
        w1 = mlp_ref[0:FEAT, :]
        b1 = mlp_ref[FEAT:FEAT + 1, :]
        w2 = mlp_ref[FEAT + 8:FEAT + 8 + COL, :]
        b2 = mlp_ref[FEAT + 8 + COL:FEAT + 9 + COL, :]
        h = jnp.maximum(
            jnp.dot(feats, w1, preferred_element_type=jnp.float32) + b1, 0.0)
        coefs = jnp.dot(h, w2, preferred_element_type=jnp.float32) + b2
        # coefs: [bm, COL]; columns >= T are exactly zero by construction.

        # output = feats + sum_t coefs[:, t] * jvp_feats_t
        # (per-task blocks sliced straight from the accumulator ref: FEAT is a
        #  multiple of 128, so these are free lane-aligned views).
        out = feats
        for t in range(T):                          # T is small and static
            lo = (t + 1) * FEAT
            jvp_t = acc_ref[:, lo:lo + FEAT] + ball_ref[:, lo:lo + FEAT]
            out = out + coefs[:, t:t + 1] * jvp_t
        o_ref[...] = out.astype(o_ref.dtype)


# ----------------------------------------------------------------------------
# One-time parameter preparation (hoisted out of the per-call path).
# ----------------------------------------------------------------------------
def prepare_params(p, compute_dtype=jnp.bfloat16):
    """Build the fused, pre-padded operand slabs once:
      * w_all = [W0 | dW_0 | ... | dW_{T-1}]  (bf16), K and N padded to x256
      * b_all = [b0 | db_0 | ... | db_{T-1}]  (f32), N padded to x256
      * mlp   = one f32 slab holding W1, b1, W2, b2 (COL = 128-aligned width)
    """
    T, D_in, FEAT = p["dW"].shape
    assert FEAT % 128 == 0, "FEAT must be 128-aligned for free lane slices"
    HID = p["W1"].shape[1]
    COL = _round_up(max(HID, T, 1), 128)
    N = (T + 1) * FEAT
    N_pad = _round_up(N, 256)          # v6e/v7x MXU is 256 wide
    D_pad = _round_up(D_in, 256)

    # fused weight slab, feature-major (each 128-lane block of the matmul
    # output maps to exactly one source matrix)
    dW_flat = jnp.transpose(p["dW"], (1, 0, 2)).reshape(D_in, T * FEAT)
    w_all = jnp.concatenate([p["W0"], dW_flat], axis=1)
    w_all = jnp.pad(w_all, ((0, D_pad - D_in), (0, N_pad - N)))
    w_all = w_all.astype(compute_dtype)

    b_all = jnp.concatenate([p["b0"], p["db"].reshape(T * FEAT)])
    b_all = jnp.pad(b_all, (0, N_pad - N))[None, :].astype(jnp.float32)

    # single f32 MetaNet slab (rows: W1 | b1(+pad) | W2 | b2(+pad))
    w1 = jnp.pad(p["W1"].astype(jnp.float32), ((0, 0), (0, COL - HID)))
    b1 = jnp.pad(p["b1"].astype(jnp.float32), (0, COL - HID))[None, :]
    b1 = jnp.pad(b1, ((0, 7), (0, 0)))                      # 8 sublane rows
    w2 = jnp.pad(p["W2"].astype(jnp.float32),
                 ((0, COL - HID), (0, COL - T)))
    b2 = jnp.pad(p["b2"].astype(jnp.float32), (0, COL - T))[None, :]
    b2 = jnp.pad(b2, ((0, 7), (0, 0)))
    mlp = jnp.concatenate([w1, b1, w2, b2], axis=0)          # [FEAT+COL+16, COL]

    return dict(w_all=w_all, b_all=b_all, mlp=mlp,
                T=int(T), FEAT=int(FEAT), HID=int(HID), COL=int(COL),
                N_pad=int(N_pad), D_in=int(D_in), D_pad=int(D_pad))


def _pick_block_k(D_pad, N_pad, bm, per_buffer_bytes=8 << 20):
    """Largest multiple of 256 dividing D_pad with one K-step's buffers
    (bf16 weight tile + f32 x tile) under ~per_buffer_bytes; BlockSpec
    double-buffers these, keeping the total well inside v7x's 64 MiB VMEM."""
    bytes_per_k_row = N_pad * 2 + bm * 4
    tk = max(256, (per_buffer_bytes // bytes_per_k_row) // 256 * 256)
    tk = min(tk, D_pad)
    while D_pad % tk:
        tk -= 256
    return max(tk, 256)


# ----------------------------------------------------------------------------
# Forward wrapper.
# ----------------------------------------------------------------------------
def metanet_linearized_forward(x, prep, *, block_m=128, block_k=None,
                               vmem_limit_bytes=48 * 1024 * 1024):
    T, FEAT, COL = prep["T"], prep["FEAT"], prep["COL"]
    N_pad, D_in, D_pad = prep["N_pad"], prep["D_in"], prep["D_pad"]

    B = x.shape[0]
    xf = x.reshape(B, -1).astype(jnp.float32)            # bf16 cast is in-kernel
    assert xf.shape[1] == D_in

    bm = _round_up(min(block_m, _round_up(B, 16)), 16)   # bf16 packs 16 rows
    Bp = _round_up(B, bm)
    if Bp != B or D_pad != D_in:
        xf = jnp.pad(xf, ((0, Bp - B), (0, D_pad - D_in)))

    if block_k is None:
        block_k = _pick_block_k(D_pad, N_pad, bm)
    assert D_pad % block_k == 0 and Bp % bm == 0

    m_tiles, k_tiles = Bp // bm, D_pad // block_k
    r_mlp = prep["mlp"].shape[0]

    # Advisory cost: dominated by the weight stream (re-read once per M tile).
    cost = pl.CostEstimate(
        flops=2 * Bp * D_pad * N_pad + 2 * Bp * (FEAT * COL + COL * COL),
        transcendentals=0,
        bytes_accessed=int(prep["w_all"].size) * 2 * m_tiles
                       + int(xf.size) * 4 + Bp * FEAT * 4
                       + (int(prep["b_all"].size) + int(prep["mlp"].size)) * 4 * m_tiles,
    )

    out = pl.pallas_call(
        functools.partial(_fused_kernel, T, FEAT, COL),
        out_shape=jax.ShapeDtypeStruct((Bp, FEAT), jnp.float32),
        grid_spec=pltpu.PrefetchScalarGridSpec(
            num_scalar_prefetch=0,
            grid=(m_tiles, k_tiles),
            in_specs=[
                pl.BlockSpec((bm, block_k), lambda m, k: (m, k)),     # x (f32)
                pl.BlockSpec((block_k, N_pad), lambda m, k: (k, 0)),  # w_all (bf16)
                pl.BlockSpec((1, N_pad), lambda m, k: (0, 0)),        # b_all (f32)
                pl.BlockSpec((r_mlp, COL), lambda m, k: (0, 0)),      # MetaNet slab
            ],
            out_specs=pl.BlockSpec((bm, FEAT), lambda m, k: (m, 0)),
            scratch_shapes=[pltpu.VMEM((bm, N_pad), jnp.float32)],    # f32 acc
        ),
        compiler_params=pltpu.CompilerParams(
            dimension_semantics=("parallel", "arbitrary"),
            vmem_limit_bytes=vmem_limit_bytes),
        cost_estimate=cost,
    )(xf, prep["w_all"], prep["b_all"], prep["mlp"])
    return out[:B]


# Pure-JAX f32 reference for validation.
def reference_forward(x, p):
    B = x.shape[0]
    xf = x.reshape(B, -1)
    feats = xf @ p["W0"] + p["b0"]
    h = jnp.maximum(feats @ p["W1"] + p["b1"], 0.0)
    coefs = h @ p["W2"] + p["b2"]
    jvp_feats = jnp.einsum("bd,tdf->btf", xf, p["dW"]) + p["db"][None]
    return feats + jnp.einsum("bt,btf->bf", coefs, jvp_feats)


if __name__ == "__main__":
    key = jax.random.PRNGKey(0)
    B, C, H, W = 2, 3, 16, 16
    D_in = C * H * W          # 768
    FEAT = 128                # feature dim of synthetic linearized base model
    T = 4                     # number of task vectors
    HID = max(FEAT // 4, T)   # MetaNet hidden dim = 32

    ks = jax.random.split(key, 10)
    x = jax.random.normal(ks[0], (B, C, H, W), jnp.float32)

    # Synthetic linearized base model params0 = (W0, b0).
    W0 = jax.random.normal(ks[1], (D_in, FEAT), jnp.float32) * 0.02
    b0 = jax.random.normal(ks[2], (FEAT,), jnp.float32) * 0.02
    # Synthetic task vectors (dW_t, db_t).
    dW = jax.random.normal(ks[3], (T, D_in, FEAT), jnp.float32) * 0.01
    db = jax.random.normal(ks[4], (T, FEAT), jnp.float32) * 0.01
    # MetaNet: first Linear ~ N(0, 0.01) (per module __init__), second Linear
    # ~ default torch uniform(+-1/sqrt(fan_in)).
    W1 = jax.random.normal(ks[5], (FEAT, HID), jnp.float32) * 0.01
    b1 = jax.random.normal(ks[6], (HID,), jnp.float32) * 0.01
    lim = 1.0 / (HID ** 0.5)
    W2 = jax.random.uniform(ks[7], (HID, T), jnp.float32, -lim, lim)
    b2 = jax.random.uniform(ks[8], (T,), jnp.float32, -lim, lim)

    params = dict(W0=W0, b0=b0, dW=dW, db=db, W1=W1, b1=b1, W2=W2, b2=b2)
    prep = prepare_params(params)                    # one-time weight prep

    # Force block_k=256 so the demo exercises the K-streamed accumulator path
    # (3 K steps); production sizes would use the auto-picked ~8 MiB tiles.
    out = metanet_linearized_forward(x, prep, block_k=256)
    out = jax.block_until_ready(out)
    assert out.shape == (B, FEAT), out.shape

    # bf16-quantized operands (what the kernel actually multiplies).
    qparams = dict(params)
    qparams["W0"] = params["W0"].astype(jnp.bfloat16).astype(jnp.float32)
    qparams["dW"] = params["dW"].astype(jnp.bfloat16).astype(jnp.float32)
    xq = x.astype(jnp.bfloat16).astype(jnp.float32)

    # 1) Algorithm check: same bf16-quantized operands, math in f32.
    ref_q = reference_forward(xq, qparams)
    assert jnp.allclose(out, ref_q, atol=5e-3, rtol=5e-3), \
        float(jnp.max(jnp.abs(out - ref_q)))

    # 2) End-to-end vs full-f32 reference: only bf16 weight-streaming error.
    ref = reference_forward(x, params)
    assert jnp.allclose(out, ref, atol=3e-2, rtol=3e-2), \
        float(jnp.max(jnp.abs(out - ref)))

    # 3) Multi-M-tile / padded-batch-remainder path (grid = (3, 3)).
    x_big = jax.random.normal(ks[9], (40, C, H, W), jnp.float32)
    out_big = jax.block_until_ready(
        metanet_linearized_forward(x_big, prep, block_m=16, block_k=256))
    ref_big = reference_forward(x_big, params)
    assert out_big.shape == (40, FEAT)
    assert jnp.allclose(out_big, ref_big, atol=3e-2, rtol=3e-2), \
        float(jnp.max(jnp.abs(out_big - ref_big)))

    print("KERNEL_OK")

    # TODO(synk): compute_intervention_loss (blockwise causal intervention) and
    # the blockwise=True coefficient path are training-time diagnostics outside
    # forward(); not implemented here.
</pallas_src>

<mosaic_0001>
module attributes {stable_mosaic.version = 11 : i64} {
  func.func @_fused_kernel(%arg0: i32, %arg1: i32, %arg2: memref<16x256xf32, #tpu.memory_space<vmem>>, %arg3: memref<256x768xbf16, #tpu.memory_space<vmem>>, %arg4: memref<1x768xf32, #tpu.memory_space<vmem>>, %arg5: memref<272x128xf32, #tpu.memory_space<vmem>>, %arg6: memref<16x128xf32, #tpu.memory_space<vmem>>, %arg7: memref<16x768xf32, #tpu.memory_space<vmem>>) attributes {dimension_semantics = [#tpu.dimension_semantics<parallel>, #tpu.dimension_semantics<arbitrary>], iteration_bounds = array<i64: 1, 3>, scalar_prefetch = 0 : i64, scratch_operands = 1 : i64, tpu.core_type = #tpu.core_type<tc>, window_params = [{transform_indices = @transform_0, window_bounds = array<i64: 16, 256>}, {transform_indices = @transform_1, window_bounds = array<i64: 256, 768>}, {pipeline_mode = #tpu.pipeline_mode<synchronous>, transform_indices = @transform_2, window_bounds = array<i64: 1, 768>}, {pipeline_mode = #tpu.pipeline_mode<synchronous>, transform_indices = @transform_3, window_bounds = array<i64: 272, 128>}, {transform_indices = @transform_4, window_bounds = array<i64: 16, 128>}]} {
    %c0_i32 = arith.constant 0 : i32
    %0 = arith.cmpi eq, %arg1, %c0_i32 : i32
    %1 = arith.extui %0 : i1 to i32
    %c0_i32_0 = arith.constant 0 : i32
    %2 = arith.cmpi ne, %1, %c0_i32_0 : i32
    scf.if %2 {
      %cst_9 = arith.constant 0.000000e+00 : f32
      %13 = vector.broadcast %cst_9 : f32 to vector<16x768xf32>
      %c0_10 = arith.constant 0 : index
      %c0_11 = arith.constant 0 : index
      %14 = vector.load %arg7[%c0_10, %c0_11] : memref<16x768xf32, #tpu.memory_space<vmem>>, vector<16x768xf32>
      tpu.vector_store %arg7[%c0_10, %c0_11], %13 {strides = array<i32>} : memref<16x768xf32, #tpu.memory_space<vmem>>, vector<16x768xf32>,
    } else {
    }
    %c0 = arith.constant 0 : index
    %c0_1 = arith.constant 0 : index
    %3 = vector.load %arg2[%c0, %c0_1] : memref<16x256xf32, #tpu.memory_space<vmem>>, vector<16x256xf32>
    %4 = arith.truncf %3 : vector<16x256xf32> to vector<16x256xbf16>
    %c0_2 = arith.constant 0 : index
    %c0_3 = arith.constant 0 : index
    %5 = vector.load %arg7[%c0_2, %c0_3] : memref<16x768xf32, #tpu.memory_space<vmem>>, vector<16x768xf32>
    %c0_4 = arith.constant 0 : index
    %c0_5 = arith.constant 0 : index
    %6 = vector.load %arg3[%c0_4, %c0_5] : memref<256x768xbf16, #tpu.memory_space<vmem>>, vector<256x768xbf16>
    %cst = arith.constant dense<0.000000e+00> : vector<16x768xf32>
    %7 = tpu.matmul %4, %6, %cst {dimension_numbers = #tpu.dot_dimension_numbers<[1], [0], [0], [1], [0, 0, 1, 1], [], []>} : vector<16x256xbf16>, vector<256x768xbf16>, vector<16x768xf32> -> vector<16x768xf32>
    %8 = arith.addf %5, %7 : vector<16x768xf32>
    %c0_6 = arith.constant 0 : index
    %c0_7 = arith.constant 0 : index
    %9 = vector.load %arg7[%c0_6, %c0_7] : memref<16x768xf32, #tpu.memory_space<vmem>>, vector<16x768xf32>
    tpu.vector_store %arg7[%c0_6, %c0_7], %8 {strides = array<i32>} : memref<16x768xf32, #tpu.memory_space<vmem>>, vector<16x768xf32>,
    %c2_i32 = arith.constant 2 : i32
    %10 = arith.cmpi eq, %arg1, %c2_i32 : i32
    %11 = arith.extui %10 : i1 to i32
    %c0_i32_8 = arith.constant 0 : i32
    %12 = arith.cmpi ne, %11, %c0_i32_8 : i32
    scf.if %12 {
      %c0_9 = arith.constant 0 : index
      %c0_10 = arith.constant 0 : index
      %13 = vector.load %arg7[%c0_9, %c0_10] : memref<16x768xf32, #tpu.memory_space<vmem>>, vector<16x128xf32>
      %c0_11 = arith.constant 0 : index
      %c0_12 = arith.constant 0 : index
      %14 = vector.load %arg4[%c0_11, %c0_12] : memref<1x768xf32, #tpu.memory_space<vmem>>, vector<1x128xf32>
      %15 = vector.broadcast %14 : vector<1x128xf32> to vector<16x128xf32>
      %16 = arith.addf %13, %15 : vector<16x128xf32>
      %c0_13 = arith.constant 0 : index
      %c0_14 = arith.constant 0 : index
      %17 = vector.load %arg5[%c0_13, %c0_14] : memref<272x128xf32, #tpu.memory_space<vmem>>, vector<128x128xf32>
      %c128 = arith.constant 128 : index
      %c0_15 = arith.constant 0 : index
      %18 = vector.load %arg5[%c128, %c0_15] : memref<272x128xf32, #tpu.memory_space<vmem>>, vector<1x128xf32>
      %c136 = arith.constant 136 : index
      %c0_16 = arith.constant 0 : index
      %19 = vector.load %arg5[%c136, %c0_16] : memref<272x128xf32, #tpu.memory_space<vmem>>, vector<128x128xf32>
      %c264 = arith.constant 264 : index
      %c0_17 = arith.constant 0 : index
      %20 = vector.load %arg5[%c264, %c0_17] : memref<272x128xf32, #tpu.memory_space<vmem>>, vector<1x128xf32>
      %cst_18 = arith.constant dense<0.000000e+00> : vector<16x128xf32>
      %21 = tpu.matmul %16, %17, %cst_18 {dimension_numbers = #tpu.dot_dimension_numbers<[1], [0], [0], [1], [0, 0, 1, 1], [], []>} : vector<16x128xf32>, vector<128x128xf32>, vector<16x128xf32> -> vector<16x128xf32>
      %22 = vector.broadcast %18 : vector<1x128xf32> to vector<16x128xf32>
      %23 = arith.addf %21, %22 : vector<16x128xf32>
      %cst_19 = arith.constant 0.000000e+00 : f32
      %24 = vector.broadcast %cst_19 : f32 to vector<16x128xf32>
      %25 = arith.maximumf %23, %24 : vector<16x128xf32>
      %cst_20 = arith.constant dense<0.000000e+00> : vector<16x128xf32>
      %26 = tpu.matmul %25, %19, %cst_20 {dimension_numbers = #tpu.dot_dimension_numbers<[1], [0], [0], [1], [0, 0, 1, 1], [], []>} : vector<16x128xf32>, vector<128x128xf32>, vector<16x128xf32> -> vector<16x128xf32>
      %27 = vector.broadcast %20 : vector<1x128xf32> to vector<16x128xf32>
      %28 = arith.addf %26, %27 : vector<16x128xf32>
      %c0_21 = arith.constant 0 : index
      %c128_22 = arith.constant 128 : index
      %29 = vector.load %arg7[%c0_21, %c128_22] : memref<16x768xf32, #tpu.memory_space<vmem>>, vector<16x128xf32>
      %c0_23 = arith.constant 0 : index
      %c128_24 = arith.constant 128 : index
      %30 = vector.load %arg4[%c0_23, %c128_24] : memref<1x768xf32, #tpu.memory_space<vmem>>, vector<1x128xf32>
      %31 = vector.broadcast %30 : vector<1x128xf32> to vector<16x128xf32>
      %32 = arith.addf %29, %31 : vector<16x128xf32>
      %33 = vector.extract_strided_slice %28 {offsets = [0, 0], sizes = [16, 1], strides = [1, 1]} : vector<16x128xf32> to vector<16x1xf32>
      %34 = vector.broadcast %33 : vector<16x1xf32> to vector<16x128xf32>
      %35 = arith.mulf %34, %32 : vector<16x128xf32>
      %36 = arith.addf %16, %35 : vector<16x128xf32>
      %c0_25 = arith.constant 0 : index
      %c256 = arith.constant 256 : index
      %37 = vector.load %arg7[%c0_25, %c256] : memref<16x768xf32, #tpu.memory_space<vmem>>, vector<16x128xf32>
      %c0_26 = arith.constant 0 : index
      %c256_27 = arith.constant 256 : index
      %38 = vector.load %arg4[%c0_26, %c256_27] : memref<1x768xf32, #tpu.memory_space<vmem>>, vector<1x128xf32>
      %39 = vector.broadcast %38 : vector<1x128xf32> to vector<16x128xf32>
      %40 = arith.addf %37, %39 : vector<16x128xf32>
      %41 = vector.extract_strided_slice %28 {offsets = [0, 1], sizes = [16, 1], strides = [1, 1]} : vector<16x128xf32> to vector<16x1xf32>
      %42 = vector.broadcast %41 : vector<16x1xf32> to vector<16x128xf32>
      %43 = arith.mulf %42, %40 : vector<16x128xf32>
      %44 = arith.addf %36, %43 : vector<16x128xf32>
      %c0_28 = arith.constant 0 : index
      %c384 = arith.constant 384 : index
      %45 = vector.load %arg7[%c0_28, %c384] : memref<16x768xf32, #tpu.memory_space<vmem>>, vector<16x128xf32>
      %c0_29 = arith.constant 0 : index
      %c384_30 = arith.constant 384 : index
      %46 = vector.load %arg4[%c0_29, %c384_30] : memref<1x768xf32, #tpu.memory_space<vmem>>, vector<1x128xf32>
      %47 = vector.broadcast %46 : vector<1x128xf32> to vector<16x128xf32>
      %48 = arith.addf %45, %47 : vector<16x128xf32>
      %49 = vector.extract_strided_slice %28 {offsets = [0, 2], sizes = [16, 1], strides = [1, 1]} : vector<16x128xf32> to vector<16x1xf32>
      %50 = vector.broadcast %49 : vector<16x1xf32> to vector<16x128xf32>
      %51 = arith.mulf %50, %48 : vector<16x128xf32>
      %52 = arith.addf %44, %51 : vector<16x128xf32>
      %c0_31 = arith.constant 0 : index
      %c512 = arith.constant 512 : index
      %53 = vector.load %arg7[%c0_31, %c512] : memref<16x768xf32, #tpu.memory_space<vmem>>, vector<16x128xf32>
      %c0_32 = arith.constant 0 : index
      %c512_33 = arith.constant 512 : index
      %54 = vector.load %arg4[%c0_32, %c512_33] : memref<1x768xf32, #tpu.memory_space<vmem>>, vector<1x128xf32>
      %55 = vector.broadcast %54 : vector<1x128xf32> to vector<16x128xf32>
      %56 = arith.addf %53, %55 : vector<16x128xf32>
      %57 = vector.extract_strided_slice %28 {offsets = [0, 3], sizes = [16, 1], strides = [1, 1]} : vector<16x128xf32> to vector<16x1xf32>
      %58 = vector.broadcast %57 : vector<16x1xf32> to vector<16x128xf32>
      %59 = arith.mulf %58, %56 : vector<16x128xf32>
      %60 = arith.addf %52, %59 : vector<16x128xf32>
      %c0_34 = arith.constant 0 : index
      %c0_35 = arith.constant 0 : index
      %61 = vector.load %arg6[%c0_34, %c0_35] : memref<16x128xf32, #tpu.memory_space<vmem>>, vector<16x128xf32>
      tpu.vector_store %arg6[%c0_34, %c0_35], %60 {strides = array<i32>} : memref<16x128xf32, #tpu.memory_space<vmem>>, vector<16x128xf32>,
    } else {
    }
    return
  }
  func.func @transform_0(%arg0: i32, %arg1: i32) -> (i32, i32) {
    %c0_i32 = arith.constant 0 : i32
    return %arg0, %arg1 : i32, i32
  }
  func.func @transform_1(%arg0: i32, %arg1: i32) -> (i32, i32) {
    %c0_i32 = arith.constant 0 : i32
    %c0_i32_0 = arith.constant 0 : i32
    return %arg1, %c0_i32 : i32, i32
  }
  func.func @transform_2(%arg0: i32, %arg1: i32) -> (i32, i32) {
    %c0_i32 = arith.constant 0 : i32
    %c0_i32_0 = arith.constant 0 : i32
    %c0_i32_1 = arith.constant 0 : i32
    return %c0_i32, %c0_i32_0 : i32, i32
  }
  func.func @transform_3(%arg0: i32, %arg1: i32) -> (i32, i32) {
    %c0_i32 = arith.constant 0 : i32
    %c0_i32_0 = arith.constant 0 : i32
    %c0_i32_1 = arith.constant 0 : i32
    return %c0_i32, %c0_i32_0 : i32, i32
  }
  func.func @transform_4(%arg0: i32, %arg1: i32) -> (i32, i32) {
    %c0_i32 = arith.constant 0 : i32
    %c0_i32_0 = arith.constant 0 : i32
    return %arg0, %c0_i32 : i32, i32
  }
}

</mosaic_0001>

<bundles_post_ra>
// kernel: tpu_custom_call.1
= control target key start
LH: loop header
LB: loop body
LE: loop exit
PB: predicated region body
PF: predicated region fallthrough
CT: control target
= control target key end

     0   :  { %s2679_s0 = inlined_call_operand.hbm [shape: f32[16,768], index: 0, kind: input, shape index: {}]   ;;  %s2680_s1 = inlined_call_operand.hbm [shape: bf16[768,768], index: 1, kind: input, shape index: {}]   ;;  %s2681_s2 = inlined_call_operand.hbm [shape: f32[1,768], index: 2, kind: input, shape index: {}]   ;;  %s2682_s3 = inlined_call_operand.hbm [shape: f32[272,128], index: 3, kind: input, shape index: {}]   ;;  %s2683_s4 = inlined_call_operand.hbm [shape: f32[16,128], index: 4, kind: output, shape index: {}]  }
   0x1   :  { %2685 = sst [smem:[#allocation18_spill]] %s2679_s0 }
   0x2   :  { %2686 = sst [smem:[#allocation19_spill]] %s2681_s2 }
   0x3   :  { %2687 = sst [smem:[#allocation20_spill]] %s2682_s3 }
   0x4   :  { %9 = vsyncpa [#allocation4], 0 }
   0x5   :  { %11 = vsyncpa [#allocation4 + $0x1], 0 }
   0x6   :  { %12 = vsyncpa [#allocation7], 0 }
   0x7   :  { %14 = vsyncpa [#allocation7 + $0x1], 0 }
   0x8   :  { %15 = vsyncpa [#allocation10], 0 }
   0x9   :  { %16 = vsyncpa [#allocation5], 0  ;;  %s2317_s15 = smov 0   ;;  %s2319_s16 = smov 0  }
   0xa   :  { %s2321_s17 = smov 0   ;;  %s2323_s18 = smov 0  }
   0xb   :  { %s2325_s19 = smov 0   ;;  %s2327_s20 = smov 0  }
   0xc LB: > { %s2346_s21 = sadd.s32 4294967295, %s2273_s20   ;;  %s43_s22 = sadd.s32 1, %s2261_s17  ;;  %s2273_s20 = sphi %s2327_s20, %s22_s20   ;;  %s2269_s19 = sphi %s2325_s19, %s2701_s19   ;;  %s2265_s18 = sphi %s2323_s18, %s2700_s18   ;;  %s2261_s17 = sphi %s2321_s17, %s2699_s17   ;;  %s2257_s16 = sphi %s2319_s16, %s2698_s16   ;;  %s2253_s15 = sphi %s2317_s15, %s2697_s15  }
   0xd   : > { %p50_p0 = scmp.ne.s32.totalorder %s2261_s17, %s2257_s16  ;;  %p51_p1 = scmp.eq.s32.totalorder %s2273_s20, 0 }
   0xe   : > { %p56_p2 = scmp.ne.s32.totalorder %s2257_s16, %s2253_s15  ;;  %p57_p3 = scmp.eq.s32.totalorder %s2346_s21, 0 }
   0xf   : > { %p2354_p4 = por %p51_p1, %p50_p0  ;;  %p1409_p5 = scmp.ge.s32.totalorder %s2273_s20, 1 }
  0x10   : > { %p2361_p6 = por %p57_p3, %p56_p2  ;;  %p161_p7 = scmp.lt.s32.totalorder %s2273_s20, 4 }
  0x11   : > { %s2690_s2 = sld [smem:[#allocation19_spill]]  ;;  %s2275_s29 = smov [#allocation8]  }
  0x12   : > { %p2369_p8 = pnand %p1409_p5, %p161_p7  ;;  %s175_s30 = sshll.u32 %s2275_s29, 4  ;;  %s176_s30 = int_to_ptr.vmem [resolvable:$true] %s175_s30 }
  0x13   : > { %p1977_p10 = scmp.lt.s32.totalorder %s2273_s20, 3  ;;  %s2692_s3 = sld [smem:[#allocation20_spill]] }
  0x14   : > { %p1961_p9 = pneg %p2369_p8  ;;  %s2276_s9 = smov [#allocation9]  }
  0x15   : > { %p2383_p12 = pnand %p1977_p10, %p2354_p4  ;;  %s186_s10 = sshll.u32 %s2276_s9, 4  ;;  %s187_s10 = int_to_ptr.vmem [resolvable:$true] %s186_s10 }
  0x16   : > { %p1962_p11 = pnand %p1961_p9, %p57_p3  ;;  %s2277_s11 = smov 128  }
  0x17   : > { %s173_s27 = sshll.u32 %s2690_s2, 4  ;;  %s2278_s12 = smov 8   ;;  %s174_s27 = int_to_ptr.hbm [resolvable:$true] %s173_s27 }
  0x18   : > { %1964 = dma.hbm_to_vmem [thread:$0]  (!%p1962_p11), %s174_s27, 96, %s176_s30, [#allocation7]  }
  0x19   : > { %s184_s7 = sshll.u32 %s2692_s3, 4  ;;  %s200_s13 = sand.u32 1, %s2261_s17   ;;  %s185_s7 = int_to_ptr.hbm [resolvable:$true] %s184_s7 }
  0x1a   : > { %1967 = dma.hbm_to_vmem [thread:$0]  (!%p1962_p11), %s185_s7, 4352, %s187_s10, [#allocation10], %s2277_s11, %s2277_s11, %s2278_s12  }
  0x1b   : > { %s31_s14 = sadd.s32 1, %s2269_s19  ;;  %s1413_s15 = sshll.u32 %s200_s13, 5 }
  0x1c   : > { %p32_p13 = scmp.ge.s32.totalorder %s31_s14, 3  ;;  %s1813_s23 = sshll.u32 %s2269_s19, 4 }
  0x1d   : > { %s2695_s0 = sld [smem:[#allocation18_spill]]  ;;  %s204_s29 = scalar_lea.vmem [#allocation3], %s1413_s15 }
  0x1e   : > { %s2703_s14 = smov (%p32_p13, %s31_s14), 0  ;;  %s215_s30 = sshll.u32 %s204_s29, 4  ;;  %s216_s30 = int_to_ptr.vmem [resolvable:$true] %s215_s30 }
  0x1f   : > { %2694 = sst [smem:[#allocation17_spill]] %s2703_s14  ;;  %s39_s5 = ssub.s32 %s2269_s19, %s2703_s14 }
  0x20   : > { %p41_p0 = scmp.eq.s32.totalorder %s39_s5, 0  ;;  %s201_s9 = scalar_lea.sflag [#allocation4], %s200_s13 }
  0x21   : > { %s2279_s10 = smov 768   ;;  %s2280_s11 = smov 256  }
  0x22   : > { %s2400_s7 = scalar_select %p41_p0, %s2261_s17, %s43_s22  }
  0x23   : > { %s212_s27 = scalar_lea.hbm %s2695_s0, %s1813_s23  ;;  %s2281_s12 = smov 16  }
  0x24   : > { %s213_s6 = sshll.u32 %s212_s27, 4  ;;  %s225_s25 = sand.u32 1, %s2273_s20   ;;  %s214_s6 = int_to_ptr.hbm [resolvable:$true] %s213_s6 }
  0x25   : > { %1971 = dma.hbm_to_vmem [thread:$0]  (!%p2383_p12), %s214_s6, 512, %s216_s30, %s201_s9, %s2279_s10, %s2280_s11, %s2281_s12  }
  0x26   : > { %s1942_s23 = smul.u32 768, %s200_s13  ;;  %s226_s22 = scalar_lea.sflag [#allocation7], %s225_s25 }
  0x27   : > { %s1943_s26 = smul.u32 768, %s2269_s19  ;;  %s2282_s3 = smov 384  }
  0x28   : > { %s229_s5 = scalar_lea.vmem [#allocation6], %s1942_s23  ;;  %s2283_s14 = smov 24  }
  0x29   : > { %s235_s27 = scalar_lea.hbm %s2680_s1, %s1943_s26  ;;  %s238_s0 = sshll.u32 %s229_s5, 4  ;;  %s239_s0 = int_to_ptr.vmem [resolvable:$true] %s238_s0 }
  0x2a   : > { %s236_s2 = sshll.u32 %s235_s27, 4  ;;  %250 = sbr.rel (%p2369_p8) target bundleno = 759 (0x2f7), region = 36  ;;  %s237_s2 = int_to_ptr.hbm [resolvable:$true] %s236_s2 }
  0x2b   : > { %1974 = dma.hbm_to_vmem [thread:$0]  (!%p2383_p12), %s237_s2, 12288, %s239_s0, %s226_s22, %s2282_s3, %s2282_s3, %s2283_s14  }
  0x2c   : > { %s252_s13 = sand.u32 (!%p2369_p8), 1, %s2257_s16  }
  0x2d   : > { %s1420_s30 = sshll.u32 (!%p2369_p8), %s252_s13, 5  ;;  %s253_s6 = scalar_lea.sflag (!%p2369_p8), [#allocation4], %s252_s13 }
  0x2e   : > { %s2414_s9 = scalar_lea.vmem (!%p2369_p8), [#allocation3], %s1420_s30 }
  0x2f   : > { %2232 = dma.done.wait (%p2361_p6), %s253_s6, 512  }
  0x30   : > { %2234 = vsyncadd (%p2361_p6), %s253_s6, 4294966784  ;;  %s262_s10 = sand.u32 1, %s2346_s21   ;;  %s1944_s8 = smul.u32 768, %s252_s13 }
  0x31   : > { %s263_s0 = scalar_lea.sflag [#allocation7], %s262_s10 }
  0x32   : > { %s2421_s2 = scalar_lea.vmem [#allocation6], %s1944_s8 }
  0x33   : > { %2236 = dma.done.wait (%p2361_p6), %s263_s0, 12288  }
  0x34   : > { %2238 = vsyncadd (%p2361_p6), %s263_s0, 4294955008 }
  0x35   : > { %2240 = dma.done.wait (%p57_p3), [#allocation7], 96  }
  0x36   : > { %2242 = vsyncadd (%p57_p3), [#allocation7], 4294967200 }
  0x37   : > { %2244 = dma.done.wait (%p57_p3), [#allocation10], 4352  }
  0x38   : > { %2246 = vsyncadd (%p57_p3), [#allocation10], 4294962944  ;;  %p1423_p1 = scmp.ne.s32.totalorder %s2265_s18, 0 }
  0x3a   : > { %309 = sbr.rel (%p1423_p1) target bundleno = 76 (0x4c), region = 56 }
  0x3f   : > { %v2284_v0 = vmov 0.0  }
  0x40   : > { %310 = vst [vmem:[#allocation2 + $0x30] sm:$0xff] %v2284_v0 }
  0x41   : > { %311 = vst [vmem:[#allocation2] sm:$0xff] %v2284_v0 }
  0x42   : > { %312 = vst [vmem:[#allocation2 + $0x58] sm:$0xff] %v2284_v0 }
  0x43   : > { %313 = vst [vmem:[#allocation2 + $0x18] sm:$0xff] %v2284_v0 }
  0x44   : > { %314 = vst [vmem:[#allocation2 + $0x50] sm:$0xff] %v2284_v0 }
  0x45   : > { %315 = vst [vmem:[#allocation2 + $0x20] sm:$0xff] %v2284_v0 }
  0x46   : > { %316 = vst [vmem:[#allocation2 + $0x8] sm:$0xff] %v2284_v0 }
  0x47   : > { %317 = vst [vmem:[#allocation2 + $0x38] sm:$0xff] %v2284_v0 }
  0x48   : > { %318 = vst [vmem:[#allocation2 + $0x28] sm:$0xff] %v2284_v0 }
  0x49   : > { %319 = vst [vmem:[#allocation2 + $0x48] sm:$0xff] %v2284_v0 }
  0x4a   : > { %320 = vst [vmem:[#allocation2 + $0x10] sm:$0xff] %v2284_v0 }
  0x4b   : > { %321 = vst [vmem:[#allocation2 + $0x40] sm:$0xff] %v2284_v0 }
  0x4c PF: > { %v1594_v1 = vld [vmem:[%s2421_s2 + $0x150] sm:$0xf]  ;;  %v1859_v2 = vld [vmem:[%s2421_s2 + $0x164] sm:$0xf0]  ;;  %v1856_v6 = vld [vmem:[%s2421_s2 + $0x154] sm:$0xf] }
  0x4d   : > { %v1786_v3 = vld [vmem:[%s2421_s2 + $0x2d0] sm:$0xf]  ;;  %v1595_v4 = vor.u32 %v1859_v2, %v1594_v1  ;;  %v1907_v5 = vld [vmem:[%s2421_s2 + $0x2e4] sm:$0xf0]  ;;  %v1596_v7 = vld [vmem:[%s2421_s2 + $0x168] sm:$0xf0] }
  0x4e   : > { %v1787_v8 = vor.u32 %v1907_v5, %v1786_v3  ;;  %v1599_v9 = vor.u32 %v1856_v6, %v1596_v7  ;;  %v1904_v10 = vld [vmem:[%s2421_s2 + $0x2d4] sm:$0xf]  ;;  %v1788_v11 = vld [vmem:[%s2421_s2 + $0x2e8] sm:$0xf0]  ;;  %v1570_v12 = vld [vmem:[%s2421_s2 + $0x120] sm:$0xf] }
  0x4f   : > { %916 = vmatpush.bf16.msra.mxu0 %v1595_v4  ;;  %v1791_v13 = vor.u32 %v1904_v10, %v1788_v11  ;;  %v1853_v14 = vld [vmem:[%s2421_s2 + $0x134] sm:$0xf0]  ;;  %v1762_v15 = vld [vmem:[%s2421_s2 + $0x2a0] sm:$0xf]  ;;  %v1850_v19 = vld [vmem:[%s2421_s2 + $0x124] sm:$0xf] }
  0x50   : > { %v1901_v16 = vld [vmem:[%s2421_s2 + $0x2b4] sm:$0xf0]  ;;  %930 = vmatpush.bf16.msra.mxu1 %v1787_v8  ;;  %944 = vmatpush.bf16.msra.mxu2 %v1599_v9  ;;  %v1571_v17 = vor.u32 %v1853_v14, %v1570_v12  ;;  %v1572_v20 = vld [vmem:[%s2421_s2 + $0x138] sm:$0xf0]  ;;  %v1898_v21 = vld [vmem:[%s2421_s2 + $0x2a4] sm:$0xf] }
  0x51   : > { %v1763_v18 = vor.u32 %v1901_v16, %v1762_v15  ;;  %958 = vmatpush.bf16.msra.mxu3 %v1791_v13  ;;  %v1575_v22 = vor.u32 %v1850_v19, %v1572_v20  ;;  %v1764_v23 = vld [vmem:[%s2421_s2 + $0x2b8] sm:$0xf0]  ;;  %v1546_v24 = vld [vmem:[%s2421_s2 + $0xf0] sm:$0xf]  ;;  %v1847_v25 = vld [vmem:[%s2421_s2 + $0x104] sm:$0xf0] }
  0x52   : > { %v1767_v26 = vor.u32 %v1898_v21, %v1764_v23  ;;  %v1738_v27 = vld [vmem:[%s2421_s2 + $0x270] sm:$0xf]  ;;  %v1895_v28 = vld [vmem:[%s2421_s2 + $0x284] sm:$0xf0]  ;;  %v1844_v29 = vld [vmem:[%s2421_s2 + $0xf4] sm:$0xf]  ;;  %v1547_v30 = vor.u32 %v1847_v25, %v1546_v24 }
  0x53   : > { %917 = vmatpush.bf16.msra.mxu0 %v1571_v17  ;;  %v1548_v31 = vld [vmem:[%s2421_s2 + $0x108] sm:$0xf0]  ;;  %v1892_v32 = vld [vmem:[%s2421_s2 + $0x274] sm:$0xf]  ;;  %v1739_v34 = vor.u32 %v1895_v28, %v1738_v27  ;;  %v1522_v36 = vld [vmem:[%s2421_s2 + $0xc0] sm:$0xf] }
  0x54   : > { %v1740_v33 = vld [vmem:[%s2421_s2 + $0x288] sm:$0xf0]  ;;  %931 = vmatpush.bf16.msra.mxu1 %v1763_v18  ;;  %945 = vmatpush.bf16.msra.mxu2 %v1575_v22  ;;  %v1551_v35 = vor.u32 %v1844_v29, %v1548_v31  ;;  %v1841_v37 = vld [vmem:[%s2421_s2 + $0xd4] sm:$0xf0]  ;;  %v1714_v38 = vld [vmem:[%s2421_s2 + $0x240] sm:$0xf] }
  0x55   : > { %959 = vmatpush.bf16.msra.mxu3 %v1767_v26  ;;  %v1743_v39 = vor.u32 %v1892_v32, %v1740_v33  ;;  %v1889_v40 = vld [vmem:[%s2421_s2 + $0x254] sm:$0xf0]  ;;  %v1838_v41 = vld [vmem:[%s2421_s2 + $0xc4] sm:$0xf]  ;;  %v1524_v42 = vld [vmem:[%s2421_s2 + $0xd8] sm:$0xf0]  ;;  %v1523_v45 = vor.u32 %v1841_v37, %v1522_v36 }
  0x56   : > { %v1886_v43 = vld [vmem:[%s2421_s2 + $0x244] sm:$0xf]  ;;  %v1716_v44 = vld [vmem:[%s2421_s2 + $0x258] sm:$0xf0]  ;;  %v1715_v46 = vor.u32 %v1889_v40, %v1714_v38  ;;  %v1527_v47 = vor.u32 %v1838_v41, %v1524_v42  ;;  %v1498_v48 = vld [vmem:[%s2421_s2 + $0x90] sm:$0xf] }
  0x57   : > { %918 = vmatpush.bf16.msra.mxu0 %v1547_v30  ;;  %v1835_v49 = vld [vmem:[%s2421_s2 + $0xa4] sm:$0xf0]  ;;  %v1690_v50 = vld [vmem:[%s2421_s2 + $0x210] sm:$0xf]  ;;  %v1719_v51 = vor.u32 %v1886_v43, %v1716_v44  ;;  %v1832_v53 = vld [vmem:[%s2421_s2 + $0x94] sm:$0xf] }
  0x58   : > { %932 = vmatpush.bf16.msra.mxu1 %v1739_v34  ;;  %946 = vmatpush.bf16.msra.mxu2 %v1551_v35  ;;  %v1883_v52 = vld [vmem:[%s2421_s2 + $0x224] sm:$0xf0]  ;;  %v1500_v54 = vld [vmem:[%s2421_s2 + $0xa8] sm:$0xf0]  ;;  %v1880_v55 = vld [vmem:[%s2421_s2 + $0x214] sm:$0xf]  ;;  %v1499_v57 = vor.u32 %v1835_v49, %v1498_v48 }
  0x59   : > { %960 = vmatpush.bf16.msra.mxu3 %v1743_v39  ;;  %v1692_v56 = vld [vmem:[%s2421_s2 + $0x228] sm:$0xf0]  ;;  %v1691_v58 = vor.u32 %v1883_v52, %v1690_v50  ;;  %v1503_v59 = vor.u32 %v1832_v53, %v1500_v54  ;;  %v1474_v60 = vld [vmem:[%s2421_s2 + $0x60] sm:$0xf]  ;;  %v1829_v61 = vld [vmem:[%s2421_s2 + $0x74] sm:$0xf0] }
  0x5a   : > { %v1666_v62 = vld [vmem:[%s2421_s2 + $0x1e0] sm:$0xf]  ;;  %v1695_v63 = vor.u32 %v1880_v55, %v1692_v56  ;;  %v1877_v0 = vld [vmem:[%s2421_s2 + $0x1f4] sm:$0xf0]  ;;  %v1826_v1 = vld [vmem:[%s2421_s2 + $0x64] sm:$0xf]  ;;  %v1475_v5 = vor.u32 %v1829_v61, %v1474_v60 }
  0x5b   : > { %919 = vmatpush.bf16.msra.mxu0 %v1523_v45  ;;  %v1476_v2 = vld [vmem:[%s2421_s2 + $0x78] sm:$0xf0]  ;;  %v1874_v3 = vld [vmem:[%s2421_s2 + $0x1e4] sm:$0xf]  ;;  %v1667_v6 = vor.u32 %v1877_v0, %v1666_v62  ;;  %v1450_v8 = vld [vmem:[%s2421_s2 + $0x30] sm:$0xf] }
  0x5c   : > { %933 = vmatpush.bf16.msra.mxu1 %v1715_v46  ;;  %947 = vmatpush.bf16.msra.mxu2 %v1527_v47  ;;  %v1668_v4 = vld [vmem:[%s2421_s2 + $0x1f8] sm:$0xf0]  ;;  %v1479_v7 = vor.u32 %v1826_v1, %v1476_v2  ;;  %v1823_v9 = vld [vmem:[%s2421_s2 + $0x44] sm:$0xf0]  ;;  %v1642_v10 = vld [vmem:[%s2421_s2 + $0x1b0] sm:$0xf] }
  0x5d   : > { %961 = vmatpush.bf16.msra.mxu3 %v1719_v51  ;;  %v1671_v11 = vor.u32 %v1874_v3, %v1668_v4  ;;  %v1871_v12 = vld [vmem:[%s2421_s2 + $0x1c4] sm:$0xf0]  ;;  %v1820_v13 = vld [vmem:[%s2421_s2 + $0x34] sm:$0xf]  ;;  %v1452_v14 = vld [vmem:[%s2421_s2 + $0x48] sm:$0xf0]  ;;  %v1451_v17 = vor.u32 %v1823_v9, %v1450_v8 }
  0x5e   : > { %v1868_v15 = vld [vmem:[%s2421_s2 + $0x1b4] sm:$0xf]  ;;  %v1644_v16 = vld [vmem:[%s2421_s2 + $0x1c8] sm:$0xf0]  ;;  %v1426_v18 = vld [vmem:[%s2421_s2] sm:$0xf]  ;;  %v1643_v20 = vor.u32 %v1871_v12, %v1642_v10  ;;  %v1455_v21 = vor.u32 %v1820_v13, %v1452_v14 }
  0x5f   : > { %920 = vmatpush.bf16.msra.mxu0 %v1499_v57  ;;  %v1817_v19 = vld [vmem:[%s2421_s2 + $0x14] sm:$0xf0]  ;;  %v1618_v22 = vld [vmem:[%s2421_s2 + $0x180] sm:$0xf]  ;;  %v1814_v24 = vld [vmem:[%s2421_s2 + $0x4] sm:$0xf]  ;;  %v1647_v25 = vor.u32 %v1868_v15, %v1644_v16 }
  0x60   : > { %934 = vmatpush.bf16.msra.mxu1 %v1691_v58  ;;  %948 = vmatpush.bf16.msra.mxu2 %v1503_v59  ;;  %v1865_v23 = vld [vmem:[%s2421_s2 + $0x194] sm:$0xf0]  ;;  %v1428_v26 = vld [vmem:[%s2421_s2 + $0x18] sm:$0xf0]  ;;  %v1862_v27 = vld [vmem:[%s2421_s2 + $0x184] sm:$0xf]  ;;  %v1427_v32 = vor.u32 %v1817_v19, %v1426_v18 }
  0x61   : > { %962 = vmatpush.bf16.msra.mxu3 %v1695_v63  ;;  %v1620_v28 = vld [vmem:[%s2421_s2 + $0x198] sm:$0xf0]  ;;  %v1602_v29 = vld [vmem:[%s2421_s2 + $0x158] sm:$0xf]  ;;  %v1860_v30 = vld [vmem:[%s2421_s2 + $0x16c] sm:$0xf0]  ;;  %v1619_v36 = vor.u32 %v1865_v23, %v1618_v22  ;;  %v1431_v37 = vor.u32 %v1814_v24, %v1428_v26 }
  0x62   : > { %v1794_v31 = vld [vmem:[%s2421_s2 + $0x2d8] sm:$0xf]  ;;  %v1908_v33 = vld [vmem:[%s2421_s2 + $0x2ec] sm:$0xf0]  ;;  %v1857_v34 = vld [vmem:[%s2421_s2 + $0x15c] sm:$0xf]  ;;  %v1623_v40 = vor.u32 %v1862_v27, %v1620_v28  ;;  %v1603_v41 = vor.u32 %v1860_v30, %v1602_v29 }
  0x63   : > { %921 = vmatpush.bf16.msra.mxu0 %v1475_v5  ;;  %v1604_v35 = vld [vmem:[%s2421_s2 + $0x170] sm:$0xf0]  ;;  %v1905_v38 = vld [vmem:[%s2421_s2 + $0x2dc] sm:$0xf]  ;;  %v1795_v42 = vor.u32 %v1908_v33, %v1794_v31  ;;  %v1578_v44 = vld [vmem:[%s2421_s2 + $0x128] sm:$0xf] }
  0x64   : > { %935 = vmatpush.bf16.msra.mxu1 %v1667_v6  ;;  %949 = vmatpush.bf16.msra.mxu2 %v1479_v7  ;;  %v1796_v39 = vld [vmem:[%s2421_s2 + $0x2f0] sm:$0xf0]  ;;  %v1607_v43 = vor.u32 %v1857_v34, %v1604_v35  ;;  %v1854_v45 = vld [vmem:[%s2421_s2 + $0x13c] sm:$0xf0]  ;;  %v1770_v46 = vld [vmem:[%s2421_s2 + $0x2a8] sm:$0xf] }
  0x65   : > { %963 = vmatpush.bf16.msra.mxu3 %v1671_v11  ;;  %v1799_v47 = vor.u32 %v1905_v38, %v1796_v39  ;;  %v1902_v48 = vld [vmem:[%s2421_s2 + $0x2bc] sm:$0xf0]  ;;  %v1851_v49 = vld [vmem:[%s2421_s2 + $0x12c] sm:$0xf]  ;;  %v1580_v50 = vld [vmem:[%s2421_s2 + $0x140] sm:$0xf0]  ;;  %v1579_v54 = vor.u32 %v1854_v45, %v1578_v44 }
  0x66   : > { %v1899_v51 = vld [vmem:[%s2421_s2 + $0x2ac] sm:$0xf]  ;;  %v1772_v52 = vld [vmem:[%s2421_s2 + $0x2c0] sm:$0xf0]  ;;  %v1554_v53 = vld [vmem:[%s2421_s2 + $0xf8] sm:$0xf]  ;;  %v1771_v58 = vor.u32 %v1902_v48, %v1770_v46  ;;  %v1583_v59 = vor.u32 %v1851_v49, %v1580_v50 }
  0x67   : > { %922 = vmatpush.bf16.msra.mxu0 %v1451_v17  ;;  %v1848_v55 = vld [vmem:[%s2421_s2 + $0x10c] sm:$0xf0]  ;;  %v1746_v56 = vld [vmem:[%s2421_s2 + $0x278] sm:$0xf]  ;;  %v1845_v60 = vld [vmem:[%s2421_s2 + $0xfc] sm:$0xf]  ;;  %v1775_v63 = vor.u32 %v1899_v51, %v1772_v52 }
  0x68   : > { %936 = vmatpush.bf16.msra.mxu1 %v1643_v20  ;;  %950 = vmatpush.bf16.msra.mxu2 %v1455_v21  ;;  %v1896_v57 = vld [vmem:[%s2421_s2 + $0x28c] sm:$0xf0]  ;;  %v1556_v61 = vld [vmem:[%s2421_s2 + $0x110] sm:$0xf0]  ;;  %v322_v62 = vld [vmem:[%s2414_s9] sm:$0xff]  ;;  %v1555_v7 = vor.u32 %v1848_v55, %v1554_v53  ;;  %p1808_p2 = scmp.ne.s32.totalorder %s2265_s18, 2 }
  0x69   : > { %964 = vmatpush.bf16.msra.mxu3 %v1647_v25  ;;  %v324_v0 = vld [vmem:[%s2414_s9 + $0x10] sm:$0xff]  ;;  %v323_v1 = vld [vmem:[%s2414_s9 + $0x8] sm:$0xff]  ;;  %v325_v2 = vld [vmem:[%s2414_s9 + $0x18] sm:$0xff]  ;;  %v1747_v8 = vor.u32 %v1896_v57, %v1746_v56  ;;  %v1559_v9 = vor.u32 %v1845_v60, %v1556_v61 }
  0x6a   : > { %v1893_v3 = vld [vmem:[%s2421_s2 + $0x27c] sm:$0xf]  ;;  %v1748_v4 = vld [vmem:[%s2421_s2 + $0x290] sm:$0xf0]  ;;  %v2528_v5 = vpack.c.bf16 %v324_v0, %v322_v62  ;;  %v2530_v6 = vpack.c.bf16 %v325_v2, %v323_v1  ;;  %v1530_v10 = vld [vmem:[%s2421_s2 + $0xc8] sm:$0xf] }
  0x6b   : > { %923 = vmatpush.bf16.msra.mxu0 %v1427_v32  ;;  %v1842_v11 = vld [vmem:[%s2421_s2 + $0xdc] sm:$0xf0]  ;;  %v1722_v12 = vld [vmem:[%s2421_s2 + $0x248] sm:$0xf]  ;;  %v1751_v13 = vor.u32 %v1893_v3, %v1748_v4  ;;  %v1839_v15 = vld [vmem:[%s2421_s2 + $0xcc] sm:$0xf] }
  0x6c   : > { %937 = vmatpush.bf16.msra.mxu1 %v1619_v36  ;;  %951 = vmatpush.bf16.msra.mxu2 %v1431_v37  ;;  %v1890_v14 = vld [vmem:[%s2421_s2 + $0x25c] sm:$0xf0]  ;;  %v1532_v16 = vld [vmem:[%s2421_s2 + $0xe0] sm:$0xf0]  ;;  %v1887_v17 = vld [vmem:[%s2421_s2 + $0x24c] sm:$0xf]  ;;  %v1531_v19 = vor.u32 %v1842_v11, %v1530_v10 }
  0x6d   : > { %965 = vmatpush.bf16.msra.mxu3 %v1623_v40  ;;  %v1724_v18 = vld [vmem:[%s2421_s2 + $0x260] sm:$0xf0]  ;;  %v1723_v20 = vor.u32 %v1890_v14, %v1722_v12  ;;  %v1535_v21 = vor.u32 %v1839_v15, %v1532_v16  ;;  %v1506_v22 = vld [vmem:[%s2421_s2 + $0x98] sm:$0xf]  ;;  %v1836_v23 = vld [vmem:[%s2421_s2 + $0xac] sm:$0xf0] }
  0x6e   : > { %924 = vmatmul.bf16.vlgmr.msra.gmra.mxu0 %v2528_v5  ;;  %v1698_v24 = vld [vmem:[%s2421_s2 + $0x218] sm:$0xf]  ;;  %v1727_v25 = vor.u32 %v1887_v17, %v1724_v18  ;;  %v1884_v26 = vld [vmem:[%s2421_s2 + $0x22c] sm:$0xf0]  ;;  %v1833_v27 = vld [vmem:[%s2421_s2 + $0x9c] sm:$0xf]  ;;  %v1507_v31 = vor.u32 %v1836_v23, %v1506_v22 }
  0x6f   : > { %972 = vmatpush.bf16.msrb.mxu0 %v1603_v41  ;;  %952 = vmatmul.bf16.vlgmr.msra.gmra.mxu2 %v2528_v5  ;;  %v1508_v28 = vld [vmem:[%s2421_s2 + $0xb0] sm:$0xf0]  ;;  %v1881_v29 = vld [vmem:[%s2421_s2 + $0x21c] sm:$0xf]  ;;  %v1699_v32 = vor.u32 %v1884_v26, %v1698_v24  ;;  %v1482_v34 = vld [vmem:[%s2421_s2 + $0x68] sm:$0xf] }
  0x70   : > { %986 = vmatpush.bf16.msrb.mxu1 %v1795_v42  ;;  %1000 = vmatpush.bf16.msrb.mxu2 %v1607_v43  ;;  %v1700_v30 = vld [vmem:[%s2421_s2 + $0x230] sm:$0xf0]  ;;  %v1511_v33 = vor.u32 %v1833_v27, %v1508_v28  ;;  %v1830_v35 = vld [vmem:[%s2421_s2 + $0x7c] sm:$0xf0]  ;;  %v1674_v36 = vld [vmem:[%s2421_s2 + $0x1e8] sm:$0xf] }
  0x71   : > { %1014 = vmatpush.bf16.msrb.mxu3 %v1799_v47  ;;  %938 = vmatmul.bf16.vlgmr.msra.gmra.mxu1 %v2530_v6  ;;  %v1703_v37 = vor.u32 %v1881_v29, %v1700_v30  ;;  %v1878_v38 = vld [vmem:[%s2421_s2 + $0x1fc] sm:$0xf0]  ;;  %v1827_v39 = vld [vmem:[%s2421_s2 + $0x6c] sm:$0xf]  ;;  %v1484_v40 = vld [vmem:[%s2421_s2 + $0x80] sm:$0xf0]  ;;  %v1483_v43 = vor.u32 %v1830_v35, %v1482_v34 }
  0x72   : > { %966 = vmatmul.bf16.vlgmr.msra.gmra.mxu3 %v2530_v6  ;;  %v1875_v41 = vld [vmem:[%s2421_s2 + $0x1ec] sm:$0xf]  ;;  %v1676_v42 = vld [vmem:[%s2421_s2 + $0x200] sm:$0xf0]  ;;  %v1675_v44 = vor.u32 %v1878_v38, %v1674_v36  ;;  %v1487_v45 = vor.u32 %v1827_v39, %v1484_v40  ;;  %v1458_v46 = vld [vmem:[%s2421_s2 + $0x38] sm:$0xf] }
  0x73   : > { %973 = vmatpush.bf16.msrb.mxu0 %v1579_v54  ;;  %v1824_v47 = vld [vmem:[%s2421_s2 + $0x4c] sm:$0xf0]  ;;  %v1650_v48 = vld [vmem:[%s2421_s2 + $0x1b8] sm:$0xf]  ;;  %v1679_v49 = vor.u32 %v1875_v41, %v1676_v42  ;;  %v1821_v51 = vld [vmem:[%s2421_s2 + $0x3c] sm:$0xf] }
  0x74   : > { %987 = vmatpush.bf16.msrb.mxu1 %v1771_v58  ;;  %1001 = vmatpush.bf16.msrb.mxu2 %v1583_v59  ;;  %v1872_v50 = vld [vmem:[%s2421_s2 + $0x1cc] sm:$0xf0]  ;;  %v1460_v52 = vld [vmem:[%s2421_s2 + $0x50] sm:$0xf0]  ;;  %v1869_v53 = vld [vmem:[%s2421_s2 + $0x1bc] sm:$0xf]  ;;  %v1459_v55 = vor.u32 %v1824_v47, %v1458_v46 }
  0x75   : > { %1015 = vmatpush.bf16.msrb.mxu3 %v1775_v63  ;;  %v1652_v54 = vld [vmem:[%s2421_s2 + $0x1d0] sm:$0xf0]  ;;  %v1434_v56 = vld [vmem:[%s2421_s2 + $0x8] sm:$0xf]  ;;  %v1818_v57 = vld [vmem:[%s2421_s2 + $0x1c] sm:$0xf0]  ;;  %v1651_v58 = vor.u32 %v1872_v50, %v1650_v48  ;;  %v1463_v59 = vor.u32 %v1821_v51, %v1460_v52 }
  0x76   : > { %v1626_v60 = vld [vmem:[%s2421_s2 + $0x188] sm:$0xf]  ;;  %v1866_v61 = vld [vmem:[%s2421_s2 + $0x19c] sm:$0xf0]  ;;  %v1815_v62 = vld [vmem:[%s2421_s2 + $0xc] sm:$0xf]  ;;  %v1655_v63 = vor.u32 %v1869_v53, %v1652_v54 }
  0x77   : > { %974 = vmatpush.bf16.msrb.mxu0 %v1555_v7  ;;  %v1436_v0 = vld [vmem:[%s2421_s2 + $0x20] sm:$0xf0]  ;;  %v1863_v1 = vld [vmem:[%s2421_s2 + $0x18c] sm:$0xf]  ;;  %v1610_v3 = vld [vmem:[%s2421_s2 + $0x160] sm:$0xf]  ;;  %v1627_v12 = vor.u32 %v1866_v61, %v1626_v60 }
  0x78   : > { %988 = vmatpush.bf16.msrb.mxu1 %v1747_v8  ;;  %1002 = vmatpush.bf16.msrb.mxu2 %v1559_v9  ;;  %v1628_v2 = vld [vmem:[%s2421_s2 + $0x1a0] sm:$0xf0]  ;;  %v1861_v4 = vld [vmem:[%s2421_s2 + $0x174] sm:$0xf0]  ;;  %v1802_v7 = vld [vmem:[%s2421_s2 + $0x2e0] sm:$0xf]  ;;  %v1435_v8 = vor.u32 %v1818_v57, %v1434_v56 }
  0x79   : > { %1016 = vmatpush.bf16.msrb.mxu3 %v1751_v13  ;;  %v1909_v9 = vld [vmem:[%s2421_s2 + $0x2f4] sm:$0xf0]  ;;  %v1858_v10 = vld [vmem:[%s2421_s2 + $0x164] sm:$0xf]  ;;  %v1612_v11 = vld [vmem:[%s2421_s2 + $0x178] sm:$0xf0]  ;;  %v1439_v13 = vor.u32 %v1815_v62, %v1436_v0  ;;  %v1631_v16 = vor.u32 %v1863_v1, %v1628_v2  ;;  %v1611_v17 = vor.u32 %v1861_v4, %v1610_v3 }
  0x7a   : > { %v1906_v14 = vld [vmem:[%s2421_s2 + $0x2e4] sm:$0xf]  ;;  %v1804_v15 = vld [vmem:[%s2421_s2 + $0x2f8] sm:$0xf0]  ;;  %v1803_v18 = vor.u32 %v1909_v9, %v1802_v7  ;;  %v1778_v22 = vld [vmem:[%s2421_s2 + $0x2b0] sm:$0xf] }
  0x7b   : > { %975 = vmatpush.bf16.msrb.mxu0 %v1531_v19  ;;  %v1615_v19 = vor.u32 %v1858_v10, %v1612_v11  ;;  %v1807_v23 = vor.u32 %v1906_v14, %v1804_v15  ;;  %v1903_v24 = vld [vmem:[%s2421_s2 + $0x2c4] sm:$0xf0]  ;;  %v1588_v26 = vld [vmem:[%s2421_s2 + $0x148] sm:$0xf0]  ;;  %v1900_v27 = vld [vmem:[%s2421_s2 + $0x2b4] sm:$0xf] }
  0x7c   : > { %989 = vmatpush.bf16.msrb.mxu1 %v1723_v20  ;;  %1003 = vmatpush.bf16.msrb.mxu2 %v1535_v21  ;;  %v1586_v20 = vld [vmem:[%s2421_s2 + $0x130] sm:$0xf]  ;;  %v1855_v21 = vld [vmem:[%s2421_s2 + $0x144] sm:$0xf0]  ;;  %v1780_v28 = vld [vmem:[%s2421_s2 + $0x2c8] sm:$0xf0]  ;;  %v1779_v30 = vor.u32 %v1903_v24, %v1778_v22 }
  0x7d   : > { %1017 = vmatpush.bf16.msrb.mxu3 %v1727_v25  ;;  %v1852_v25 = vld [vmem:[%s2421_s2 + $0x134] sm:$0xf]  ;;  %v1587_v29 = vor.u32 %v1855_v21, %v1586_v20  ;;  %v1754_v34 = vld [vmem:[%s2421_s2 + $0x280] sm:$0xf]  ;;  %v1783_v35 = vor.u32 %v1900_v27, %v1780_v28  ;;  %v1897_v36 = vld [vmem:[%s2421_s2 + $0x294] sm:$0xf0] }
  0x7e   : > { %v1564_v38 = vld [vmem:[%s2421_s2 + $0x118] sm:$0xf0]  ;;  %v1894_v39 = vld [vmem:[%s2421_s2 + $0x284] sm:$0xf]  ;;  %v1755_v42 = vor.u32 %v1897_v36, %v1754_v34  ;;  %v1730_v46 = vld [vmem:[%s2421_s2 + $0x250] sm:$0xf] }
  0x7f   : > { %976 = vmatpush.bf16.msrb.mxu0 %v1507_v31  ;;  %v1591_v31 = vor.u32 %v1852_v25, %v1588_v26  ;;  %v1756_v40 = vld [vmem:[%s2421_s2 + $0x298] sm:$0xf0]  ;;  %v1891_v48 = vld [vmem:[%s2421_s2 + $0x264] sm:$0xf0]  ;;  %v1540_v50 = vld [vmem:[%s2421_s2 + $0xe8] sm:$0xf0] }
  0x80   : > { %990 = vmatpush.bf16.msrb.mxu1 %v1699_v32  ;;  %1004 = vmatpush.bf16.msrb.mxu2 %v1511_v33  ;;  %v1562_v32 = vld [vmem:[%s2421_s2 + $0x100] sm:$0xf]  ;;  %v1849_v33 = vld [vmem:[%s2421_s2 + $0x114] sm:$0xf0]  ;;  %v1759_v47 = vor.u32 %v1894_v39, %v1756_v40  ;;  %v1888_v51 = vld [vmem:[%s2421_s2 + $0x254] sm:$0xf]  ;;  %v1731_v54 = vor.u32 %v1891_v48, %v1730_v46 }
  0x81   : > { %1018 = vmatpush.bf16.msrb.mxu3 %v1703_v37  ;;  %v1846_v37 = vld [vmem:[%s2421_s2 + $0x104] sm:$0xf]  ;;  %v1563_v41 = vor.u32 %v1849_v33, %v1562_v32  ;;  %v1732_v52 = vld [vmem:[%s2421_s2 + $0x268] sm:$0xf0]  ;;  %v1514_v56 = vld [vmem:[%s2421_s2 + $0xa0] sm:$0xf] }
  0x82   : > { %v1837_v57 = vld [vmem:[%s2421_s2 + $0xb4] sm:$0xf0]  ;;  %v1834_v61 = vld [vmem:[%s2421_s2 + $0xa4] sm:$0xf]  ;;  %v1516_v62 = vld [vmem:[%s2421_s2 + $0xb8] sm:$0xf0] }
  0x83   : > { %977 = vmatpush.bf16.msrb.mxu0 %v1483_v43  ;;  %v1567_v43 = vor.u32 %v1846_v37, %v1564_v38  ;;  %v1885_v60 = vld [vmem:[%s2421_s2 + $0x234] sm:$0xf0]  ;;  %v1708_v0 = vld [vmem:[%s2421_s2 + $0x238] sm:$0xf0]  ;;  %v1515_v1 = vor.u32 %v1837_v57, %v1514_v56  ;;  %v1519_v3 = vor.u32 %v1834_v61, %v1516_v62  ;;  %v1490_v4 = vld [vmem:[%s2421_s2 + $0x70] sm:$0xf] }
  0x84   : > { %991 = vmatpush.bf16.msrb.mxu1 %v1675_v44  ;;  %1005 = vmatpush.bf16.msrb.mxu2 %v1487_v45  ;;  %v1538_v44 = vld [vmem:[%s2421_s2 + $0xd0] sm:$0xf]  ;;  %v1843_v45 = vld [vmem:[%s2421_s2 + $0xe4] sm:$0xf0]  ;;  %v1828_v11 = vld [vmem:[%s2421_s2 + $0x74] sm:$0xf] }
  0x85   : > { %1019 = vmatpush.bf16.msrb.mxu3 %v1679_v49  ;;  %v1840_v49 = vld [vmem:[%s2421_s2 + $0xd4] sm:$0xf]  ;;  %v1539_v53 = vor.u32 %v1843_v45, %v1538_v44  ;;  %v1831_v7 = vld [vmem:[%s2421_s2 + $0x84] sm:$0xf0]  ;;  %v1684_v14 = vld [vmem:[%s2421_s2 + $0x208] sm:$0xf0] }
  0x86   : > { %v1879_v10 = vld [vmem:[%s2421_s2 + $0x204] sm:$0xf0]  ;;  %v1491_v15 = vor.u32 %v1831_v7, %v1490_v4  ;;  %v1658_v20 = vld [vmem:[%s2421_s2 + $0x1c0] sm:$0xf]  ;;  %v1873_v22 = vld [vmem:[%s2421_s2 + $0x1d4] sm:$0xf0] }
  0x87   : > { %978 = vmatpush.bf16.msrb.mxu0 %v1459_v55  ;;  %v1543_v55 = vor.u32 %v1840_v49, %v1540_v50  ;;  %v1468_v24 = vld [vmem:[%s2421_s2 + $0x58] sm:$0xf0]  ;;  %v1870_v25 = vld [vmem:[%s2421_s2 + $0x1c4] sm:$0xf]  ;;  %v1659_v28 = vor.u32 %v1873_v22, %v1658_v20  ;;  %v1634_v32 = vld [vmem:[%s2421_s2 + $0x190] sm:$0xf] }
  0x88   : > { %992 = vmatpush.bf16.msrb.mxu1 %v1651_v58  ;;  %1006 = vmatpush.bf16.msrb.mxu2 %v1463_v59  ;;  %v1706_v58 = vld [vmem:[%s2421_s2 + $0x220] sm:$0xf]  ;;  %v1735_v59 = vor.u32 %v1888_v51, %v1732_v52  ;;  %v1660_v26 = vld [vmem:[%s2421_s2 + $0x1d8] sm:$0xf0]  ;;  %v1867_v34 = vld [vmem:[%s2421_s2 + $0x1a4] sm:$0xf0] }
  0x89   : > { %1020 = vmatpush.bf16.msrb.mxu3 %v1655_v63  ;;  %v1882_v63 = vld [vmem:[%s2421_s2 + $0x224] sm:$0xf]  ;;  %v1707_v2 = vor.u32 %v1885_v60, %v1706_v58  ;;  %v1663_v33 = vor.u32 %v1870_v25, %v1660_v26  ;;  %v1444_v36 = vld [vmem:[%s2421_s2 + $0x28] sm:$0xf0]  ;;  %v1864_v37 = vld [vmem:[%s2421_s2 + $0x194] sm:$0xf]  ;;  %v1635_v40 = vor.u32 %v1867_v34, %v1634_v32 }
  0x8a   : > { %v1711_v9 = vor.u32 %v1882_v63, %v1708_v0  ;;  %v1636_v38 = vld [vmem:[%s2421_s2 + $0x1a8] sm:$0xf0]  ;;  %v328_v44 = vld [vmem:[#allocation2 + $0x30] sm:$0xff]  ;;  %v329_v49 = vld [vmem:[#allocation2] sm:$0xff] }
  0x8b   : > { %979 = vmatpush.bf16.msrb.mxu0 %v1435_v8  ;;  %v1682_v8 = vld [vmem:[%s2421_s2 + $0x1f0] sm:$0xf]  ;;  %v330_v62 = vld [vmem:[#allocation2 + $0x58] sm:$0xff]  ;;  %v333_v25 = vld [vmem:[#allocation2 + $0x20] sm:$0xff] }
  0x8c   : > { %993 = vmatpush.bf16.msrb.mxu1 %v1627_v12  ;;  %1007 = vmatpush.bf16.msrb.mxu2 %v1439_v13  ;;  %v1492_v12 = vld [vmem:[%s2421_s2 + $0x88] sm:$0xf0]  ;;  %v1876_v13 = vld [vmem:[%s2421_s2 + $0x1f4] sm:$0xf] }
  0x8d   : > { %1021 = vmatpush.bf16.msrb.mxu3 %v1631_v16  ;;  %v1683_v16 = vor.u32 %v1879_v10, %v1682_v8  ;;  %v1687_v21 = vor.u32 %v1876_v13, %v1684_v14  ;;  %v336_v10 = vld [vmem:[#allocation2 + $0x28] sm:$0xff]  ;;  %v332_v20 = vld [vmem:[#allocation2 + $0x50] sm:$0xff] }
  0x8e   : > { %980 = vmatmul.bf16.vlgmr.msrb.gmra.mxu0 %v2528_v5 }
  0x8f   : > { %1028 = vmatpush.bf16.msra.mxu0 %v1611_v17  ;;  %1008 = vmatmul.bf16.vlgmr.msrb.gmra.mxu2 %v2528_v5  ;;  %v1495_v17 = vor.u32 %v1828_v11, %v1492_v12 }
  0x90   : > { %1042 = vmatpush.bf16.msra.mxu1 %v1803_v18  ;;  %1056 = vmatpush.bf16.msra.mxu2 %v1615_v19  ;;  %v1466_v18 = vld [vmem:[%s2421_s2 + $0x40] sm:$0xf]  ;;  %v1825_v19 = vld [vmem:[%s2421_s2 + $0x54] sm:$0xf0] }
  0x91   : > { %1070 = vmatpush.bf16.msra.mxu3 %v1807_v23  ;;  %994 = vmatmul.bf16.vlgmr.msrb.gmra.mxu1 %v2530_v6  ;;  %v1822_v23 = vld [vmem:[%s2421_s2 + $0x44] sm:$0xf]  ;;  %v1467_v27 = vor.u32 %v1825_v19, %v1466_v18 }
  0x92   : > { %1022 = vmatmul.bf16.vlgmr.msrb.gmra.mxu3 %v2530_v6 }
  0x93   : > { %1029 = vmatpush.bf16.msra.mxu0 %v1587_v29  ;;  %v1471_v29 = vor.u32 %v1822_v23, %v1468_v24 }
  0x94   : > { %1043 = vmatpush.bf16.msra.mxu1 %v1779_v30  ;;  %1057 = vmatpush.bf16.msra.mxu2 %v1591_v31  ;;  %v1442_v30 = vld [vmem:[%s2421_s2 + $0x10] sm:$0xf]  ;;  %v1819_v31 = vld [vmem:[%s2421_s2 + $0x24] sm:$0xf0] }
  0x95   : > { %1071 = vmatpush.bf16.msra.mxu3 %v1783_v35  ;;  %v1816_v35 = vld [vmem:[%s2421_s2 + $0x14] sm:$0xf]  ;;  %v1443_v39 = vor.u32 %v1819_v31, %v1442_v30 }
  0x97   : > { %1030 = vmatpush.bf16.msra.mxu0 %v1563_v41  ;;  %v1447_v41 = vor.u32 %v1816_v35, %v1444_v36  ;;  %v339_v35 = vld [vmem:[#allocation2 + $0x40] sm:$0xff] }
  0x98   : > { %1044 = vmatpush.bf16.msra.mxu1 %v1755_v42  ;;  %1058 = vmatpush.bf16.msra.mxu2 %v1567_v43  ;;  %v1639_v42 = vor.u32 %v1864_v37, %v1636_v38 }
  0x99   : > { %1072 = vmatpush.bf16.msra.mxu3 %v1759_v47 }
  0x9b   : > { %1031 = vmatpush.bf16.msra.mxu0 %v1539_v53 }
  0x9c   : > { %1045 = vmatpush.bf16.msra.mxu1 %v1731_v54  ;;  %1059 = vmatpush.bf16.msra.mxu2 %v1543_v55  ;;  %v334_v54 = vld [vmem:[#allocation2 + $0x8] sm:$0xff] }
  0x9d   : > { %1073 = vmatpush.bf16.msra.mxu3 %v1735_v59 }
  0x9f   : > { %1032 = vmatpush.bf16.msra.mxu0 %v1515_v1 }
  0xa0   : > { %1046 = vmatpush.bf16.msra.mxu1 %v1707_v2  ;;  %1060 = vmatpush.bf16.msra.mxu2 %v1519_v3  ;;  %v331_v3 = vld [vmem:[#allocation2 + $0x18] sm:$0xff] }
  0xa1   : > { %1074 = vmatpush.bf16.msra.mxu3 %v1711_v9 }
  0xa3   : > { %1033 = vmatpush.bf16.msra.mxu0 %v1491_v15  ;;  %v337_v15 = vld [vmem:[#allocation2 + $0x48] sm:$0xff] }
  0xa4   : > { %1047 = vmatpush.bf16.msra.mxu1 %v1683_v16  ;;  %1061 = vmatpush.bf16.msra.mxu2 %v1495_v17 }
  0xa5   : > { %1075 = vmatpush.bf16.msra.mxu3 %v1687_v21 }
  0xa7   : > { %1034 = vmatpush.bf16.msra.mxu0 %v1467_v27 }
  0xa8   : > { %1048 = vmatpush.bf16.msra.mxu1 %v1659_v28  ;;  %1062 = vmatpush.bf16.msra.mxu2 %v1471_v29  ;;  %v338_v29 = vld [vmem:[#allocation2 + $0x10] sm:$0xff] }
  0xa9   : > { %1076 = vmatpush.bf16.msra.mxu3 %v1663_v33 }
  0xab   : > { %1035 = vmatpush.bf16.msra.mxu0 %v1443_v39 }
  0xac   : > { %1049 = vmatpush.bf16.msra.mxu1 %v1635_v40  ;;  %1063 = vmatpush.bf16.msra.mxu2 %v1447_v41 }
  0xad   : > { %1077 = vmatpush.bf16.msra.mxu3 %v1639_v42 }
  0xae   : > { %1036 = vmatmul.bf16.vlgmr.msra.gmra.mxu0 %v2528_v5 }
  0xaf   : > { %1050 = vmatmul.bf16.vlgmr.msra.gmra.mxu1 %v2530_v6  ;;  %1064 = vmatmul.bf16.vlgmr.msra.gmra.mxu2 %v2528_v5 }
  0xb0   : > { %1078 = vmatmul.bf16.vlgmr.msra.gmra.mxu3 %v2530_v6  ;;  %v335_v6 = vld [vmem:[#allocation2 + $0x38] sm:$0xff] }
  0xeb   : > { %v925_v43 = vpop.f32.mrf.mxu0 }
  0xee   : > { %v939_v45 = vpop.f32.mrf.mxu1 }
  0xef   : > { %v940_v46 = vadd.f32 %v939_v45, %v925_v43 }
  0xf1   : > { %v1084_v47 = vadd.f32 %v940_v46, %v328_v44 }
  0xf2   : > { %v953_v48 = vpop.f32.mrf.mxu2 }
  0xf3   : > { %1096 = vst [vmem:[#allocation2 + $0x30] sm:$0xff] %v1084_v47  ;;  %v927_v52 = vpop.f32.mrf.mxu0 }
  0xf5   : > { %v967_v50 = vpop.f32.mrf.mxu3 }
  0xf6   : > { %v968_v51 = vadd.f32 %v967_v50, %v953_v48  ;;  %v941_v55 = vpop.f32.mrf.mxu1 }
  0xf7   : > { %v942_v56 = vadd.f32 %v941_v55, %v927_v52 }
  0xf8   : > { %v1085_v53 = vadd.f32 %v968_v51, %v329_v49 }
  0xf9   : > { %v1090_v57 = vadd.f32 %v942_v56, %v334_v54 }
  0xfa   : > { %1097 = vst [vmem:[#allocation2] sm:$0xff] %v1085_v53  ;;  %v955_v5 = vpop.f32.mrf.mxu2 }
  0xfb   : > { %1102 = vst [vmem:[#allocation2 + $0x8] sm:$0xff] %v1090_v57 }
  0xfd   : > { %v969_v58 = vpop.f32.mrf.mxu3 }
  0xfe   : > { %v970_v59 = vadd.f32 %v969_v58, %v955_v5 }
 0x100   : > { %v1091_v60 = vadd.f32 %v970_v59, %v335_v6 }
 0x102   : > { %1103 = vst [vmem:[#allocation2 + $0x38] sm:$0xff] %v1091_v60 }
 0x10b   : > { %v981_v61 = vpop.f32.mrf.mxu0 }
 0x10e   : > { %v995_v63 = vpop.f32.mrf.mxu1 }
 0x10f   : > { %v996_v0 = vadd.f32 %v995_v63, %v981_v61 }
 0x111   : > { %v1086_v1 = vadd.f32 %v996_v0, %v330_v62 }
 0x112   : > { %v1009_v2 = vpop.f32.mrf.mxu2 }
 0x113   : > { %1098 = vst [vmem:[#allocation2 + $0x58] sm:$0xff] %v1086_v1  ;;  %v983_v8 = vpop.f32.mrf.mxu0 }
 0x115   : > { %v1023_v4 = vpop.f32.mrf.mxu3 }
 0x116   : > { %v1024_v7 = vadd.f32 %v1023_v4, %v1009_v2  ;;  %v997_v11 = vpop.f32.mrf.mxu1 }
 0x117   : > { %v998_v12 = vadd.f32 %v997_v11, %v983_v8 }
 0x118   : > { %v1087_v9 = vadd.f32 %v1024_v7, %v331_v3 }
 0x119   : > { %v1092_v13 = vadd.f32 %v998_v12, %v336_v10 }
 0x11a   : > { %1099 = vst [vmem:[#allocation2 + $0x18] sm:$0xff] %v1087_v9  ;;  %v1011_v14 = vpop.f32.mrf.mxu2 }
 0x11b   : > { %1104 = vst [vmem:[#allocation2 + $0x28] sm:$0xff] %v1092_v13 }
 0x11d   : > { %v1025_v16 = vpop.f32.mrf.mxu3 }
 0x11e   : > { %v1026_v17 = vadd.f32 %v1025_v16, %v1011_v14 }
 0x120   : > { %v1093_v18 = vadd.f32 %v1026_v17, %v337_v15 }
 0x122   : > { %1105 = vst [vmem:[#allocation2 + $0x48] sm:$0xff] %v1093_v18 }
 0x12b   : > { %v1037_v19 = vpop.f32.mrf.mxu0 }
 0x12c   : > { %v1051_v21 = vpop.f32.mrf.mxu1 }
 0x12d   : > { %v1052_v22 = vadd.f32 %v1051_v21, %v1037_v19 }
 0x12f   : > { %v1088_v23 = vadd.f32 %v1052_v22, %v332_v20 }
 0x131   : > { %1100 = vst [vmem:[#allocation2 + $0x50] sm:$0xff] %v1088_v23 }
 0x132   : > { %v1065_v24 = vpop.f32.mrf.mxu2 }
 0x133   : > { %v1079_v26 = vpop.f32.mrf.mxu3  ;;  %v1039_v27 = vpop.f32.mrf.mxu0 }
 0x134   : > { %v1080_v28 = vadd.f32 %v1079_v26, %v1065_v24  ;;  %v1053_v30 = vpop.f32.mrf.mxu1 }
 0x135   : > { %v1054_v31 = vadd.f32 %v1053_v30, %v1039_v27 }
 0x136   : > { %v1089_v32 = vadd.f32 %v1080_v28, %v333_v25 }
 0x137   : > { %v1094_v33 = vadd.f32 %v1054_v31, %v338_v29 }
 0x138   : > { %1101 = vst [vmem:[#allocation2 + $0x20] sm:$0xff] %v1089_v32 }
 0x139   : > { %1106 = vst [vmem:[#allocation2 + $0x10] sm:$0xff] %v1094_v33 }
 0x13a   : > { %v1067_v34 = vpop.f32.mrf.mxu2 }
 0x13b   : > { %v1081_v36 = vpop.f32.mrf.mxu3 }
 0x13c   : > { %v1082_v37 = vadd.f32 %v1081_v36, %v1067_v34  ;;  %1111 = sbr.rel (%p1808_p2) target bundleno = 753 (0x2f1), region = 60 }
 0x13e   : > { %v1095_v38 = vadd.f32 %v1082_v37, %v339_v35 }
 0x140   : > { %1107 = vst [vmem:[#allocation2 + $0x40] sm:$0xff] %v1095_v38 }
 0x141   : > { %v1135_v39 = vld [vmem:[#allocation9 + $0x78] sm:$0xff]  ;;  %v1134_v40 = vld [vmem:[#allocation9 + $0x70] sm:$0xff]  ;;  %v1133_v41 = vld [vmem:[#allocation9 + $0x68] sm:$0xff]  ;;  %v2285_v19 = vmov 0   ;;  %v2286_v20 = vmov 1   ;;  %v2287_v21 = vmov 2  }
 0x142   : > { %1155 = vmatpush.msra.mxu0 %v1135_v39  ;;  %1910 = vmatpush.msra.mxu2 %v1135_v39  ;;  %v1132_v42 = vld [vmem:[#allocation9 + $0x60] sm:$0xff]  ;;  %v1131_v43 = vld [vmem:[#allocation9 + $0x58] sm:$0xff]  ;;  %v1130_v46 = vld [vmem:[#allocation9 + $0x50] sm:$0xff]  ;;  %v2288_v27 = vmov 3  }
 0x143   : > { %v1152_v44 = vld [vmem:[#allocation9 + $0x100] sm:$0xff]  ;;  %v1151_v45 = vld [vmem:[#allocation9 + $0xf8] sm:$0xff]  ;;  %v1150_v47 = vld [vmem:[#allocation9 + $0xf0] sm:$0xff]  ;;  %2047 = vset.pattern.permute.xlu0 %v2285_v19  ;;  %2048 = vset.pattern.permute.xlu1 %v2286_v20 }
 0x144   : > { %1156 = vmatpush.msra.mxu0 %v1134_v40  ;;  %1911 = vmatpush.msra.mxu2 %v1134_v40  ;;  %v1129_v48 = vld [vmem:[#allocation9 + $0x48] sm:$0xff]  ;;  %v1128_v49 = vld [vmem:[#allocation9 + $0x40] sm:$0xff]  ;;  %v1127_v52 = vld [vmem:[#allocation9 + $0x38] sm:$0xff] }
 0x145   : > { %1181 = vmatpush.msra.mxu1 %v1152_v44  ;;  %1926 = vmatpush.msra.mxu3 %v1152_v44  ;;  %v1149_v50 = vld [vmem:[#allocation9 + $0xe8] sm:$0xff]  ;;  %v1148_v51 = vld [vmem:[#allocation9 + $0xe0] sm:$0xff]  ;;  %v1147_v53 = vld [vmem:[#allocation9 + $0xd8] sm:$0xff] }
 0x146   : > { %1157 = vmatpush.msra.mxu0 %v1133_v41  ;;  %1912 = vmatpush.msra.mxu2 %v1133_v41  ;;  %v1126_v54 = vld [vmem:[#allocation9 + $0x30] sm:$0xff]  ;;  %v1125_v56 = vld [vmem:[#allocation9 + $0x28] sm:$0xff]  ;;  %v1124_v5 = vld [vmem:[#allocation9 + $0x20] sm:$0xff] }
 0x147   : > { %1182 = vmatpush.msra.mxu1 %v1151_v45  ;;  %1927 = vmatpush.msra.mxu3 %v1151_v45  ;;  %v1146_v55 = vld [vmem:[#allocation9 + $0xd0] sm:$0xff]  ;;  %v1145_v57 = vld [vmem:[#allocation9 + $0xc8] sm:$0xff]  ;;  %v1144_v6 = vld [vmem:[#allocation9 + $0xc0] sm:$0xff] }
 0x148   : > { %1158 = vmatpush.msra.mxu0 %v1132_v42  ;;  %1913 = vmatpush.msra.mxu2 %v1132_v42  ;;  %v1123_v58 = vld [vmem:[#allocation9 + $0x18] sm:$0xff]  ;;  %v1122_v60 = vld [vmem:[#allocation9 + $0x10] sm:$0xff]  ;;  %v1113_v63 = vld [vmem:[#allocation2 + $0x8] sm:$0xff] }
 0x149   : > { %1183 = vmatpush.msra.mxu1 %v1150_v47  ;;  %1928 = vmatpush.msra.mxu3 %v1150_v47  ;;  %v1143_v59 = vld [vmem:[#allocation9 + $0xb8] sm:$0xff]  ;;  %v1112_v62 = vld [vmem:[#allocation2 + $0x30] sm:$0xff]  ;;  %v1120_v3 = vld [vmem:[#allocation9] sm:$0xff] }
 0x14a   : > { %1159 = vmatpush.msra.mxu0 %v1131_v43  ;;  %1914 = vmatpush.msra.mxu2 %v1131_v43  ;;  %v2052_v61 = vld [vmem:[#allocation8] ss:$0 sm:$0xff]  ;;  %v1142_v0 = vld [vmem:[#allocation9 + $0xb0] sm:$0xff]  ;;  %v1121_v1 = vld [vmem:[#allocation9 + $0x8] sm:$0xff] }
 0x14b   : > { %1184 = vmatpush.msra.mxu1 %v1149_v50  ;;  %1929 = vmatpush.msra.mxu3 %v1149_v50  ;;  %v1141_v2 = vld [vmem:[#allocation9 + $0xa8] sm:$0xff]  ;;  %v2649_v4 = vadd.f32 %v2052_v61, %v1112_v62  ;;  %v2651_v7 = vadd.f32 %v2052_v61, %v1113_v63  ;;  %v1140_v8 = vld [vmem:[#allocation9 + $0xa0] sm:$0xff]  ;;  %v1139_v9 = vld [vmem:[#allocation9 + $0x98] sm:$0xff] }
 0x14c   : > { %1160 = vmatpush.msra.mxu0 %v1130_v46  ;;  %1915 = vmatpush.msra.mxu2 %v1130_v46  ;;  %v1138_v10 = vld [vmem:[#allocation9 + $0x90] sm:$0xff]  ;;  %v1137_v11 = vld [vmem:[#allocation9 + $0x88] sm:$0xff]  ;;  %v2053_v12 = vld [vmem:[#allocation9 + $0x80] ss:$0 sm:$0xff] }
 0x14d   : > { %1185 = vmatpush.msra.mxu1 %v1148_v51  ;;  %1930 = vmatpush.msra.mxu3 %v1148_v51  ;;  %v2054_v22 = vld [vmem:[#allocation9 + $0x108] ss:$0 sm:$0xff]  ;;  %v2056_v28 = vld [vmem:[#allocation8 + $0x1] ss:$0 sm:$0xff]  ;;  %v2057_v34 = vld [vmem:[#allocation8 + $0x2] ss:$0 sm:$0xff] }
 0x14e   : > { %1161 = vmatpush.msra.mxu0 %v1129_v48  ;;  %1916 = vmatpush.msra.mxu2 %v1129_v48  ;;  %v1204_v29 = vld [vmem:[#allocation2] sm:$0xff]  ;;  %v1205_v35 = vld [vmem:[#allocation2 + $0x38] sm:$0xff]  ;;  %v1227_v37 = vld [vmem:[#allocation2 + $0x28] sm:$0xff] }
 0x14f   : > { %1186 = vmatpush.msra.mxu1 %v1147_v53  ;;  %1931 = vmatpush.msra.mxu3 %v1147_v53  ;;  %v1210_v33 = vadd.f32 %v2056_v28, %v1204_v29  ;;  %v1226_v36 = vld [vmem:[#allocation2 + $0x58] sm:$0xff]  ;;  %v1211_v38 = vadd.f32 %v2056_v28, %v1205_v35  ;;  %v1233_v41 = vadd.f32 %v2057_v34, %v1227_v37  ;;  %v2055_v43 = vld [vmem:[#allocation8 + $0x3] ss:$0 sm:$0xff]  ;;  %v1247_v44 = vld [vmem:[#allocation2 + $0x48] sm:$0xff] }
 0x150   : > { %1162 = vmatpush.msra.mxu0 %v1128_v49  ;;  %1917 = vmatpush.msra.mxu2 %v1128_v49  ;;  %v1232_v40 = vadd.f32 %v2057_v34, %v1226_v36  ;;  %v1246_v46 = vld [vmem:[#allocation2 + $0x18] sm:$0xff]  ;;  %v2058_v48 = vld [vmem:[#allocation8 + $0x4] ss:$0 sm:$0xff]  ;;  %v1267_v51 = vld [vmem:[#allocation2 + $0x10] sm:$0xff] }
 0x151   : > { %1187 = vmatpush.msra.mxu1 %v1146_v55  ;;  %1932 = vmatpush.msra.mxu3 %v1146_v55  ;;  %v1266_v55 = vld [vmem:[#allocation2 + $0x50] sm:$0xff] }
 0x152   : > { %1163 = vmatpush.msra.mxu0 %v1127_v52  ;;  %1918 = vmatpush.msra.mxu2 %v1127_v52  ;;  %v1253_v52 = vadd.f32 %v2055_v43, %v1247_v44 }
 0x153   : > { %1188 = vmatpush.msra.mxu1 %v1145_v57  ;;  %1933 = vmatpush.msra.mxu3 %v1145_v57 }
 0x154   : > { %1164 = vmatpush.msra.mxu0 %v1126_v54  ;;  %1919 = vmatpush.msra.mxu2 %v1126_v54 }
 0x155   : > { %1189 = vmatpush.msra.mxu1 %v1144_v6  ;;  %1934 = vmatpush.msra.mxu3 %v1144_v6  ;;  %v1273_v6 = vadd.f32 %v2058_v48, %v1267_v51 }
 0x156   : > { %1165 = vmatpush.msra.mxu0 %v1125_v56  ;;  %1920 = vmatpush.msra.mxu2 %v1125_v56  ;;  %v1252_v56 = vadd.f32 %v2055_v43, %v1246_v46 }
 0x157   : > { %1190 = vmatpush.msra.mxu1 %v1143_v59  ;;  %1935 = vmatpush.msra.mxu3 %v1143_v59  ;;  %v1272_v59 = vadd.f32 %v2058_v48, %v1266_v55 }
 0x158   : > { %1166 = vmatpush.msra.mxu0 %v1124_v5  ;;  %1921 = vmatpush.msra.mxu2 %v1124_v5 }
 0x159   : > { %1191 = vmatpush.msra.mxu1 %v1142_v0  ;;  %1936 = vmatpush.msra.mxu3 %v1142_v0 }
 0x15a   : > { %1167 = vmatpush.msra.mxu0 %v1123_v58  ;;  %1922 = vmatpush.msra.mxu2 %v1123_v58 }
 0x15b   : > { %1192 = vmatpush.msra.mxu1 %v1141_v2  ;;  %1937 = vmatpush.msra.mxu3 %v1141_v2 }
 0x15c   : > { %1168 = vmatpush.msra.mxu0 %v1122_v60  ;;  %1923 = vmatpush.msra.mxu2 %v1122_v60 }
 0x15d   : > { %1193 = vmatpush.msra.mxu1 %v1140_v8  ;;  %1938 = vmatpush.msra.mxu3 %v1140_v8 }
 0x15e   : > { %1169 = vmatpush.msra.mxu0 %v1121_v1  ;;  %1924 = vmatpush.msra.mxu2 %v1121_v1 }
 0x15f   : > { %1194 = vmatpush.msra.mxu1 %v1139_v9  ;;  %1939 = vmatpush.msra.mxu3 %v1139_v9 }
 0x160   : > { %1170 = vmatpush.msra.mxu0 %v1120_v3  ;;  %1925 = vmatpush.msra.mxu2 %v1120_v3 }
 0x161   : > { %1171 = vmatmul.f32.vlgmr.msra.gmra.mxu0 %v2649_v4  ;;  %1174 = vmatmul.f32.vlgmr.msra.gmra.mxu2 %v2651_v7 }
 0x162   : > { %1195 = vmatpush.msra.mxu1 %v1138_v10  ;;  %1940 = vmatpush.msra.mxu3 %v1138_v10 }
 0x163   : > { %2049 = vset.pattern.permute.xlu2 %v2287_v21 }
 0x164   : > { %1196 = vmatpush.msra.mxu1 %v1137_v11  ;;  %1941 = vmatpush.msra.mxu3 %v1137_v11 }
 0x1de   : > { %v1172_v13 = vpop.f32.mrf.mxu0 }
 0x1df   : > { %v1173_v14 = vadd.f32 %v2053_v12, %v1172_v13 }
 0x1e1   : > { %v1178_v15 = vmax.f32 %v1173_v14, 0.0 }
 0x1e3   : > { %1197 = vmatmul.f32.vlgmr.msra.gmra.mxu1 %v1178_v15 }
 0x1e4   : > { %v1175_v16 = vpop.f32.mrf.mxu2 }
 0x1e5   : > { %v1176_v17 = vadd.f32 %v2053_v12, %v1175_v16 }
 0x1e7   : > { %v1179_v18 = vmax.f32 %v1176_v17, 0.0 }
 0x1e9   : > { %1200 = vmatmul.f32.vlgmr.msra.gmra.mxu3 %v1179_v18 }
 0x260   : > { %v1198_v23 = vpop.f32.mrf.mxu1 }
 0x261   : > { %v1199_v24 = vadd.f32 %v2054_v22, %v1198_v23 }
 0x263   : > { %1214 = vperm.xlu0 %2047, %v1199_v24   ;;  %1235 = vperm.xlu1 %2048, %v1199_v24  }
 0x264   : > { %1255 = vperm.xlu2 %2049, %v1199_v24  }
 0x26c   : > { %v1201_v25 = vpop.f32.mrf.mxu3 }
 0x26d   : > { %v1202_v26 = vadd.f32 %v2054_v22, %v1201_v25 }
 0x26f   : > { %1259 = vperm.xlu2 %2049, %v1202_v26   ;;  %1239 = vperm.xlu1 %2048, %v1202_v26  }
 0x270   : > { %1219 = vperm.xlu0 %2047, %v1202_v26  }
 0x277   : > { %2051 = vset.pattern.permute.xlu1 %v2288_v27 }
 0x278   : > { %2050 = vset.pattern.permute.xlu0 %v2288_v27  ;;  %1279 = vperm.xlu1 %2051, %v1202_v26  }
 0x279   : > { %1275 = vperm.xlu0 %2050, %v1199_v24  }
 0x2be   : > { %v1256_v32 = vpop.permute.xlu2 %1255 }
 0x2bf   : > { %v1262_v61 = vmul.f32 %v1256_v32, %v1252_v56 }
 0x2c9   : > { %v1260_v57 = vpop.permute.xlu2 %1259 }
 0x2ca   : > { %v1263_v60 = vmul.f32 %v1260_v57, %v1253_v52 }
 0x2d5   : > { %v1236_v30 = vpop.permute.xlu1 %1235  ;;  %v1215_v31 = vpop.permute.xlu0 %1214 }
 0x2d6   : > { %v1222_v39 = vmul.f32 %v1215_v31, %v1210_v33  ;;  %v1242_v50 = vmul.f32 %v1236_v30, %v1232_v40 }
 0x2d8   : > { %v1224_v49 = vadd.f32 %v1222_v39, %v2649_v4 }
 0x2da   : > { %v1244_v58 = vadd.f32 %v1242_v50, %v1224_v49 }
 0x2dc   : > { %v1264_v2 = vadd.f32 %v1262_v61, %v1244_v58 }
 0x2e1   : > { %v1240_v42 = vpop.permute.xlu1 %1239 }
 0x2e2   : > { %v1220_v45 = vpop.permute.xlu0 %1219  ;;  %v1243_v53 = vmul.f32 %v1240_v42, %v1233_v41 }
 0x2e3   : > { %v1223_v47 = vmul.f32 %v1220_v45, %v1211_v38 }
 0x2e5   : > { %v1225_v54 = vadd.f32 %v1223_v47, %v2651_v7 }
 0x2e7   : > { %v1245_v5 = vadd.f32 %v1243_v53, %v1225_v54 }
 0x2e9   : > { %v1265_v63 = vadd.f32 %v1263_v60, %v1245_v5 }
 0x2ea   : > { %v1280_v62 = vpop.permute.xlu1 %1279 }
 0x2eb   : > { %v1283_v0 = vmul.f32 %v1280_v62, %v1273_v6  ;;  %v1276_v1 = vpop.permute.xlu0 %1275 }
 0x2ec   : > { %v1282_v3 = vmul.f32 %v1276_v1, %v1272_v59 }
 0x2ed   : > { %v1285_v4 = vadd.f32 %v1283_v0, %v1265_v63 }
 0x2ee   : > { %v1284_v8 = vadd.f32 %v1282_v3, %v1264_v2 }
 0x2ef   : > { %1287 = vst [vmem:[#allocation11 + $0x8] sm:$0xff] %v1285_v4 }
 0x2f0   : > { %1286 = vst [vmem:[#allocation11] sm:$0xff] %v1284_v8 }
 0x2f1 PF: > { %p1980_p3 = scmp.eq.s32.totalorder %s2346_s21, 2  ;;  %s1298_s24 = sshll.u32 %s2683_s4, 4  ;;  %s1299_s24 = int_to_ptr.hbm [resolvable:$true] %s1298_s24 }
 0x2f2   : > { %s2289_s28 = smov [#allocation11]   ;;  %s2290_s11 = smov 128  }
 0x2f3   : > { %s1296_s14 = sshll.u32 %s2289_s28, 4  ;;  %s2291_s12 = smov 8   ;;  %s1297_s14 = int_to_ptr.vmem [resolvable:$true] %s1296_s14 }
 0x2f4   : > { %1958 = dma.vmem_to_hbm [thread:$0]  (%p1980_p3), %s1297_s14, 256, %s1299_s24, [#allocation5], %s2290_s11, %s2290_s11, %s2291_s12  }
 0x2f5   : > { %2248 = dma.done.wait (%p1980_p3), [#allocation5], 256  }
 0x2f6   : > { %2250 = vsyncadd (%p1980_p3), [#allocation5], 4294967040 }
 0x2f7 PF: > { %s22_s20 = sadd.s32 1, %s2273_s20   ;;  %s2696_s21 = sld [smem:[#allocation17_spill]] }
 0x2f8   : > { %p19_p4 = scmp.ge.s32.totalorder %s22_s20, 5   ;;  %s2697_s15 = smov %s2257_s16 }
 0x2f9   : > { %s2698_s16 = smov %s2261_s17  ;;  %s2699_s17 = smov %s2400_s7 }
 0x2fa   : > { %s2700_s18 = smov %s2269_s19  ;;  %21 = sbr.rel (!%p19_p4) target bundleno = 12 (0xc), region = 103 }
 0x2fd   : > { %s2701_s19 = smov %s2696_s21 }
 0x2ff   :  { %1315 = vsyncpa [#allocation4], 1 }
 0x300   :  { %1317 = vsyncpa [#allocation4 + $0x1], 1 }
 0x301   :  { %1318 = vsyncpa [#allocation7], 1 }
 0x302   :  { %1320 = vsyncpa [#allocation7 + $0x1], 1 }
 0x303   :  { %1321 = vsyncpa [#allocation10], 1 }
 0x304   :  { %1322 = vsyncpa [#allocation5], 1 }
 0x305   :  { %1324 = vsyncpa [#allocation5 + $0x1], 1 }

</bundles_post_ra>
